<compile_context>
chip_gen: v7x
topology: tpu7x:2x2x1
jax: 0.10.0
libtpu: 0.0.40
codegen_flags: <defaults>
</compile_context>

<pallas_src>
import math

import jax
import jax.numpy as jnp
from jax import lax
from jax.experimental import pallas as pl
from jax.experimental.pallas import tpu as pltpu

_INV_SQRT2 = 1.0 / math.sqrt(2.0)
_EPS = 1e-5            # nn.InstanceNorm2d default
_PAD = 5               # max dilation in the block -> H halo rows
_LANES = 128
_MXU_M = 256           # target matmul M rows per grid step (v6e/v7x MXU height)
_MM_DTYPE = jnp.bfloat16   # matmul staging dtype (set to jnp.float32 for exact parity)


def _banded_weights(w, d, W, cin_pad):
    """w: (3, 3, Cin, Cout) HWIO -> (3*W*cin_pad, W*Cout) stacked banded matrix.

    Within the kh block, row w_in*cin_pad + ci, column w_out*Cout + co holds
    w[kh, kw, ci, co] when w_in == w_out + (kw-1)*d; taps outside [0, W) are
    simply absent, which reproduces the conv's zero 'same' padding along W.
    The three kh blocks are stacked along K so each dilated 3x3 conv becomes
    a single matmul against the kh-concatenated activation slab.
    """
    _, _, cin, cout = w.shape
    if cin_pad != cin:
        w = jnp.pad(w, ((0, 0), (0, 0), (0, cin_pad - cin), (0, 0)))
    blocks = []
    for kh in range(3):
        m = jnp.zeros((W * cin_pad, W * cout), jnp.float32)
        for kw in range(3):
            e = jnp.eye(W, W, k=-(kw - 1) * d, dtype=jnp.float32)
            m = m + jnp.kron(e, w[kh, kw])
        blocks.append(m)
    return jnp.concatenate(blocks, axis=0).astype(_MM_DTYPE)


def _make_fused_kernel(nb, H, W, cin_p, Cout):
    Hp = H + 2 * _PAD
    WCo = W * Cout
    nbH = nb * H
    inv_hw = 1.0 / float(H * W)

    def conv_adn(read, m_ref, b_row, s_mat, d):
        # One MXU matmul per layer: the three kh-shifted slabs are concatenated
        # along K, matching the (3*K_in, W*Cout) stacked banded weight matrix.
        slabs = [read(_PAD + (kh - 1) * d).reshape(nbH, -1) for kh in range(3)]
        lhs = jnp.concatenate(slabs, axis=-1).astype(_MM_DTYPE)
        y = jnp.dot(lhs, m_ref[...], preferred_element_type=jnp.float32)
        y = y + b_row                                       # bias, lane-dense, f32
        # A: exact (erf) GELU -- PyTorch nn.GELU default
        y = 0.5 * y * (1.0 + lax.erf(y * _INV_SQRT2))
        # D: dropout=None -> identity
        # N: InstanceNorm2d (per image, per channel over HxW, biased variance,
        #    affine=False).  One-pass stats; the per-channel lane reduction /
        #    broadcast is a small matmul with S = kron(ones(W,W), eye(Cout)).
        y3 = y.reshape(nb, H, WCo)
        s1 = jnp.dot(jnp.sum(y3, axis=1), s_mat,
                     preferred_element_type=jnp.float32)        # (nb, WCo)
        s2 = jnp.dot(jnp.sum(y3 * y3, axis=1), s_mat,
                     preferred_element_type=jnp.float32)        # (nb, WCo)
        mean = s1 * inv_hw
        var = jnp.maximum(s2 * inv_hw - mean * mean, 0.0)
        inv_std = lax.rsqrt(var + _EPS)
        return (y3 - mean[:, None, :]) * inv_std[:, None, :]    # (nb, H, WCo) f32

    def kernel(x_ref, m1_ref, m2_ref, m3_ref, b_ref, s_ref, o_ref, act_ref):
        # act_ref: (nb, Hp, WCo) VMEM scratch holding the H-padded intermediate
        # activation.  Only the two _PAD-row halo bands must be zero (the
        # interior is fully overwritten each layer); re-zeroing them every step
        # (~10 KiB of stores) keeps this correct even if the batch grid axis is
        # sharded across TensorCores.
        zeros_halo = jnp.zeros((nb, _PAD, WCo), jnp.float32)
        act_ref[:, 0:_PAD, :] = zeros_halo
        act_ref[:, _PAD + H:Hp, :] = zeros_halo

        s_mat = s_ref[...]
        y = conv_adn(lambda o: x_ref[:, o:o + H, :], m1_ref, b_ref[0:1, :], s_mat, 1)
        act_ref[:, _PAD:_PAD + H, :] = y
        y = conv_adn(lambda o: act_ref[:, o:o + H, :], m2_ref, b_ref[1:2, :], s_mat, 3)
        act_ref[:, _PAD:_PAD + H, :] = y
        y = conv_adn(lambda o: act_ref[:, o:o + H, :], m3_ref, b_ref[2:3, :], s_mat, 5)
        o_ref[...] = y

    return kernel


def init_dilation_block_params(key, in_channels, out_channels):
    """Deterministic synthetic parameters. Weights stored HWIO: (3, 3, Cin, Cout)."""
    params = {}
    cin = in_channels
    for i, name in enumerate(("conv1", "conv2", "conv3")):
        kw_key, kb_key = jax.random.split(jax.random.fold_in(key, i))
        w_torch = 0.1 * jax.random.normal(kw_key, (out_channels, cin, 3, 3),
                                          dtype=jnp.float32)
        b = 0.1 * jax.random.normal(kb_key, (out_channels,), dtype=jnp.float32)
        params[name] = {"w": jnp.transpose(w_torch, (2, 3, 1, 0)), "b": b}
        cin = out_channels
    return params


@jax.jit
def dilation_block_forward(x_nchw, params):
    """DilationBlock.forward. Input/Output: NCHW f32, like the PyTorch module."""
    N, Cin, H, W = x_nchw.shape
    Cout = params["conv1"]["w"].shape[-1]
    Hp = H + 2 * _PAD
    WCo = W * Cout

    # Pad Cin so the layer-1 K (= W*Cin) fills whole 128-lane vregs.
    if (W * Cin) % _LANES != 0 and _LANES % W == 0:
        cin_p = ((W * Cin + _LANES - 1) // _LANES) * _LANES // W
    else:
        cin_p = Cin

    # Batch nb images per grid step so the matmul M dimension is nb*H.
    nb = max(1, min(N, _MXU_M // H)) if H <= _MXU_M else 1
    g = -(-N // nb)
    n_pad = g * nb

    # NCHW -> NHWC; zero-pad batch / H-halo / channels; flatten to lane-dense rows.
    x = jnp.transpose(x_nchw, (0, 2, 3, 1)).astype(jnp.float32)
    x = jnp.pad(x, ((0, n_pad - N), (_PAD, _PAD), (0, 0), (0, cin_p - Cin)))
    x_ld = x.reshape(n_pad, Hp, W * cin_p)

    # Pre-stacked banded weight matrices (bf16) and lane-dense biases (f32).
    m1 = _banded_weights(params["conv1"]["w"], 1, W, cin_p)   # (3*W*cin_p, WCo)
    m2 = _banded_weights(params["conv2"]["w"], 3, W, Cout)    # (3*WCo, WCo)
    m3 = _banded_weights(params["conv3"]["w"], 5, W, Cout)    # (3*WCo, WCo)
    b_all = jnp.stack([jnp.tile(params[n]["b"], W)
                       for n in ("conv1", "conv2", "conv3")]).astype(jnp.float32)
    # Per-channel lane-sum / broadcast matrix for InstanceNorm statistics.
    s_mat = jnp.kron(jnp.ones((W, W), jnp.float32),
                     jnp.eye(Cout, dtype=jnp.float32))        # (WCo, WCo)

    kernel = _make_fused_kernel(nb, H, W, cin_p, Cout)
    out_ld = pl.pallas_call(
        kernel,
        out_shape=jax.ShapeDtypeStruct((n_pad, H, WCo), jnp.float32),
        grid=(g,),
        in_specs=[
            pl.BlockSpec((nb, Hp, W * cin_p), lambda n: (n, 0, 0)),
            pl.BlockSpec((3 * W * cin_p, WCo), lambda n: (0, 0)),
            pl.BlockSpec((3 * WCo, WCo), lambda n: (0, 0)),
            pl.BlockSpec((3 * WCo, WCo), lambda n: (0, 0)),
            pl.BlockSpec((3, WCo), lambda n: (0, 0)),
            pl.BlockSpec((WCo, WCo), lambda n: (0, 0)),
        ],
        out_specs=pl.BlockSpec((nb, H, WCo), lambda n: (n, 0, 0)),
        scratch_shapes=[pltpu.VMEM((nb, Hp, WCo), jnp.float32)],
        # "parallel" lets the batch axis shard across TensorCores on v7x; it is
        # neutral on single-core v5e/v6e.
        # TODO(synk): for larger W, put pipeline_mode=pl.Buffered(1) on the
        # grid-invariant weight specs and/or tile W — banded-weight VMEM grows
        # O(W^2) and v7x only has 64 MiB physical VMEM.
        compiler_params=pltpu.CompilerParams(dimension_semantics=("parallel",)),
    )(x_ld, m1, m2, m3, b_all, s_mat)

    out = out_ld[:N].reshape(N, H, W, Cout)
    return jnp.transpose(out, (0, 3, 1, 2))


def _reference_forward(x_nchw, params):
    """Pure-JAX reference (conv + erf-GELU + InstanceNorm), NCHW in/out."""
    x = jnp.transpose(x_nchw, (0, 2, 3, 1)).astype(jnp.float32)
    for name, d in (("conv1", 1), ("conv2", 3), ("conv3", 5)):
        w = params[name]["w"]
        b = params[name]["b"]
        y = lax.conv_general_dilated(
            x, w, window_strides=(1, 1), padding=((d, d), (d, d)),
            rhs_dilation=(d, d),
            dimension_numbers=("NHWC", "HWIO", "NHWC"),
            precision=lax.Precision.HIGHEST)
        y = y + b
        y = 0.5 * y * (1.0 + lax.erf(y * _INV_SQRT2))
        mean = jnp.mean(y, axis=(1, 2), keepdims=True)
        var = jnp.mean((y - mean) ** 2, axis=(1, 2), keepdims=True)
        x = (y - mean) * lax.rsqrt(var + _EPS)
    return jnp.transpose(x, (0, 3, 1, 2))


if __name__ == "__main__":
    key = jax.random.PRNGKey(0)
    k_x, k_p = jax.random.split(key)

    in_channels, out_channels = 4, 8
    x = jax.random.normal(k_x, (2, in_channels, 16, 16), dtype=jnp.float32)
    params = init_dilation_block_params(k_p, in_channels, out_channels)

    out = dilation_block_forward(x, params)
    jax.block_until_ready(out)
    assert out.shape == (2, out_channels, 16, 16), out.shape

    ref = _reference_forward(x, params)
    # bf16-staged MXU matmuls (three chained layers) vs. the f32 HIGHEST-precision
    # reference: ~2^-9 relative operand rounding per layer gives a few e-3 typical
    # and ~1e-2 worst-case deviation on the unit-scale normalized outputs.
    tol = 3e-2 if _MM_DTYPE == jnp.bfloat16 else 3e-3
    err = float(jnp.max(jnp.abs(out - ref)))
    assert jnp.allclose(out, ref, atol=tol, rtol=tol), err

    print("KERNEL_OK")
</pallas_src>

<mosaic_0001>
module attributes {stable_mosaic.version = 11 : i64} {
  func.func @kernel(%arg0: i32, %arg1: memref<2x26x128xf32, #tpu.memory_space<vmem>>, %arg2: memref<384x128xbf16, #tpu.memory_space<vmem>>, %arg3: memref<384x128xbf16, #tpu.memory_space<vmem>>, %arg4: memref<384x128xbf16, #tpu.memory_space<vmem>>, %arg5: memref<3x128xf32, #tpu.memory_space<vmem>>, %arg6: memref<128x128xf32, #tpu.memory_space<vmem>>, %arg7: memref<2x16x128xf32, #tpu.memory_space<vmem>>, %arg8: memref<2x26x128xf32, #tpu.memory_space<vmem>>) attributes {dimension_semantics = [#tpu.dimension_semantics<parallel>], iteration_bounds = array<i64: 1>, scalar_prefetch = 0 : i64, scratch_operands = 1 : i64, tpu.core_type = #tpu.core_type<tc>, window_params = [{transform_indices = @transform_0, window_bounds = array<i64: 2, 26, 128>}, {pipeline_mode = #tpu.pipeline_mode<synchronous>, transform_indices = @transform_1, window_bounds = array<i64: 384, 128>}, {pipeline_mode = #tpu.pipeline_mode<synchronous>, transform_indices = @transform_2, window_bounds = array<i64: 384, 128>}, {pipeline_mode = #tpu.pipeline_mode<synchronous>, transform_indices = @transform_3, window_bounds = array<i64: 384, 128>}, {pipeline_mode = #tpu.pipeline_mode<synchronous>, transform_indices = @transform_4, window_bounds = array<i64: 3, 128>}, {pipeline_mode = #tpu.pipeline_mode<synchronous>, transform_indices = @transform_5, window_bounds = array<i64: 128, 128>}, {transform_indices = @transform_6, window_bounds = array<i64: 2, 16, 128>}]} {
    %cst = arith.constant 0.000000e+00 : f32
    %0 = vector.broadcast %cst : f32 to vector<2x5x128xf32>
    %c0 = arith.constant 0 : index
    %c0_0 = arith.constant 0 : index
    %c0_1 = arith.constant 0 : index
    %1 = vector.load %arg8[%c0, %c0_0, %c0_1] : memref<2x26x128xf32, #tpu.memory_space<vmem>>, vector<2x5x128xf32>
    tpu.vector_store %arg8[%c0, %c0_0, %c0_1], %0 {strides = array<i32>} : memref<2x26x128xf32, #tpu.memory_space<vmem>>, vector<2x5x128xf32>,
    %c0_2 = arith.constant 0 : index
    %c21 = arith.constant 21 : index
    %c0_3 = arith.constant 0 : index
    %2 = vector.load %arg8[%c0_2, %c21, %c0_3] : memref<2x26x128xf32, #tpu.memory_space<vmem>>, vector<2x5x128xf32>
    tpu.vector_store %arg8[%c0_2, %c21, %c0_3], %0 {strides = array<i32>} : memref<2x26x128xf32, #tpu.memory_space<vmem>>, vector<2x5x128xf32>,
    %c0_4 = arith.constant 0 : index
    %c0_5 = arith.constant 0 : index
    %3 = vector.load %arg6[%c0_4, %c0_5] : memref<128x128xf32, #tpu.memory_space<vmem>>, vector<128x128xf32>
    %c0_6 = arith.constant 0 : index
    %c0_7 = arith.constant 0 : index
    %4 = vector.load %arg5[%c0_6, %c0_7] : memref<3x128xf32, #tpu.memory_space<vmem>>, vector<1x128xf32>
    %c0_8 = arith.constant 0 : index
    %c4 = arith.constant 4 : index
    %c0_9 = arith.constant 0 : index
    %5 = vector.load %arg1[%c0_8, %c4, %c0_9] : memref<2x26x128xf32, #tpu.memory_space<vmem>>, vector<2x16x128xf32>
    %6 = vector.shape_cast %5 : vector<2x16x128xf32> to vector<32x128xf32>
    %c0_10 = arith.constant 0 : index
    %c5 = arith.constant 5 : index
    %c0_11 = arith.constant 0 : index
    %7 = vector.load %arg1[%c0_10, %c5, %c0_11] : memref<2x26x128xf32, #tpu.memory_space<vmem>>, vector<2x16x128xf32>
    %8 = vector.shape_cast %7 : vector<2x16x128xf32> to vector<32x128xf32>
    %c0_12 = arith.constant 0 : index
    %c6 = arith.constant 6 : index
    %c0_13 = arith.constant 0 : index
    %9 = vector.load %arg1[%c0_12, %c6, %c0_13] : memref<2x26x128xf32, #tpu.memory_space<vmem>>, vector<2x16x128xf32>
    %10 = vector.shape_cast %9 : vector<2x16x128xf32> to vector<32x128xf32>
    %11 = tpu.concatenate %6, %8, %10 in 1 : vector<32x128xf32>, vector<32x128xf32>, vector<32x128xf32> -> vector<32x384xf32>
    %12 = arith.truncf %11 : vector<32x384xf32> to vector<32x384xbf16>
    %c0_14 = arith.constant 0 : index
    %c0_15 = arith.constant 0 : index
    %13 = vector.load %arg2[%c0_14, %c0_15] : memref<384x128xbf16, #tpu.memory_space<vmem>>, vector<384x128xbf16>
    %cst_16 = arith.constant dense<0.000000e+00> : vector<32x128xf32>
    %14 = tpu.matmul %12, %13, %cst_16 {dimension_numbers = #tpu.dot_dimension_numbers<[1], [0], [0], [1], [0, 0, 1, 1], [], []>} : vector<32x384xbf16>, vector<384x128xbf16>, vector<32x128xf32> -> vector<32x128xf32>
    %15 = vector.broadcast %4 : vector<1x128xf32> to vector<32x128xf32>
    %16 = arith.addf %14, %15 : vector<32x128xf32>
    %cst_17 = arith.constant 5.000000e-01 : f32
    %17 = vector.broadcast %cst_17 : f32 to vector<32x128xf32>
    %18 = arith.mulf %17, %16 : vector<32x128xf32>
    %cst_18 = arith.constant 0.707106769 : f32
    %19 = vector.broadcast %cst_18 : f32 to vector<32x128xf32>
    %20 = arith.mulf %16, %19 : vector<32x128xf32>
    %21 = math.erf %20 : vector<32x128xf32>
    %cst_19 = arith.constant 1.000000e+00 : f32
    %22 = vector.broadcast %cst_19 : f32 to vector<32x128xf32>
    %23 = arith.addf %22, %21 : vector<32x128xf32>
    %24 = arith.mulf %18, %23 : vector<32x128xf32>
    %25 = vector.shape_cast %24 : vector<32x128xf32> to vector<2x16x128xf32>
    %cst_20 = arith.constant dense<0.000000e+00> : vector<2x128xf32>
    %26 = vector.multi_reduction <add>, %25, %cst_20 [1] : vector<2x16x128xf32> to vector<2x128xf32>
    %cst_21 = arith.constant dense<0.000000e+00> : vector<2x128xf32>
    %27 = tpu.matmul %26, %3, %cst_21 {dimension_numbers = #tpu.dot_dimension_numbers<[1], [0], [0], [1], [0, 0, 1, 1], [], []>} : vector<2x128xf32>, vector<128x128xf32>, vector<2x128xf32> -> vector<2x128xf32>
    %28 = arith.mulf %25, %25 : vector<2x16x128xf32>
    %cst_22 = arith.constant dense<0.000000e+00> : vector<2x128xf32>
    %29 = vector.multi_reduction <add>, %28, %cst_22 [1] : vector<2x16x128xf32> to vector<2x128xf32>
    %cst_23 = arith.constant dense<0.000000e+00> : vector<2x128xf32>
    %30 = tpu.matmul %29, %3, %cst_23 {dimension_numbers = #tpu.dot_dimension_numbers<[1], [0], [0], [1], [0, 0, 1, 1], [], []>} : vector<2x128xf32>, vector<128x128xf32>, vector<2x128xf32> -> vector<2x128xf32>
    %cst_24 = arith.constant 3.906250e-03 : f32
    %31 = vector.broadcast %cst_24 : f32 to vector<2x128xf32>
    %32 = arith.mulf %27, %31 : vector<2x128xf32>
    %cst_25 = arith.constant 3.906250e-03 : f32
    %33 = vector.broadcast %cst_25 : f32 to vector<2x128xf32>
    %34 = arith.mulf %30, %33 : vector<2x128xf32>
    %35 = arith.mulf %32, %32 : vector<2x128xf32>
    %36 = arith.subf %34, %35 : vector<2x128xf32>
    %cst_26 = arith.constant 0.000000e+00 : f32
    %37 = vector.broadcast %cst_26 : f32 to vector<2x128xf32>
    %38 = arith.maximumf %36, %37 : vector<2x128xf32>
    %cst_27 = arith.constant 9.99999974E-6 : f32
    %39 = vector.broadcast %cst_27 : f32 to vector<2x128xf32>
    %40 = arith.addf %38, %39 : vector<2x128xf32>
    %41 = math.rsqrt %40 : vector<2x128xf32>
    %42 = vector.shape_cast %32 : vector<2x128xf32> to vector<2x1x128xf32>
    %43 = vector.broadcast %42 : vector<2x1x128xf32> to vector<2x16x128xf32>
    %44 = arith.subf %25, %43 : vector<2x16x128xf32>
    %45 = vector.shape_cast %41 : vector<2x128xf32> to vector<2x1x128xf32>
    %46 = vector.broadcast %45 : vector<2x1x128xf32> to vector<2x16x128xf32>
    %47 = arith.mulf %44, %46 : vector<2x16x128xf32>
    %c0_28 = arith.constant 0 : index
    %c5_29 = arith.constant 5 : index
    %c0_30 = arith.constant 0 : index
    %48 = vector.load %arg8[%c0_28, %c5_29, %c0_30] : memref<2x26x128xf32, #tpu.memory_space<vmem>>, vector<2x16x128xf32>
    tpu.vector_store %arg8[%c0_28, %c5_29, %c0_30], %47 {strides = array<i32>} : memref<2x26x128xf32, #tpu.memory_space<vmem>>, vector<2x16x128xf32>,
    %c1 = arith.constant 1 : index
    %c0_31 = arith.constant 0 : index
    %49 = vector.load %arg5[%c1, %c0_31] : memref<3x128xf32, #tpu.memory_space<vmem>>, vector<1x128xf32>
    %c0_32 = arith.constant 0 : index
    %c2 = arith.constant 2 : index
    %c0_33 = arith.constant 0 : index
    %50 = vector.load %arg8[%c0_32, %c2, %c0_33] : memref<2x26x128xf32, #tpu.memory_space<vmem>>, vector<2x16x128xf32>
    %51 = vector.shape_cast %50 : vector<2x16x128xf32> to vector<32x128xf32>
    %c0_34 = arith.constant 0 : index
    %c5_35 = arith.constant 5 : index
    %c0_36 = arith.constant 0 : index
    %52 = vector.load %arg8[%c0_34, %c5_35, %c0_36] : memref<2x26x128xf32, #tpu.memory_space<vmem>>, vector<2x16x128xf32>
    %53 = vector.shape_cast %52 : vector<2x16x128xf32> to vector<32x128xf32>
    %c0_37 = arith.constant 0 : index
    %c8 = arith.constant 8 : index
    %c0_38 = arith.constant 0 : index
    %54 = vector.load %arg8[%c0_37, %c8, %c0_38] : memref<2x26x128xf32, #tpu.memory_space<vmem>>, vector<2x16x128xf32>
    %55 = vector.shape_cast %54 : vector<2x16x128xf32> to vector<32x128xf32>
    %56 = tpu.concatenate %51, %53, %55 in 1 : vector<32x128xf32>, vector<32x128xf32>, vector<32x128xf32> -> vector<32x384xf32>
    %57 = arith.truncf %56 : vector<32x384xf32> to vector<32x384xbf16>
    %c0_39 = arith.constant 0 : index
    %c0_40 = arith.constant 0 : index
    %58 = vector.load %arg3[%c0_39, %c0_40] : memref<384x128xbf16, #tpu.memory_space<vmem>>, vector<384x128xbf16>
    %cst_41 = arith.constant dense<0.000000e+00> : vector<32x128xf32>
    %59 = tpu.matmul %57, %58, %cst_41 {dimension_numbers = #tpu.dot_dimension_numbers<[1], [0], [0], [1], [0, 0, 1, 1], [], []>} : vector<32x384xbf16>, vector<384x128xbf16>, vector<32x128xf32> -> vector<32x128xf32>
    %60 = vector.broadcast %49 : vector<1x128xf32> to vector<32x128xf32>
    %61 = arith.addf %59, %60 : vector<32x128xf32>
    %cst_42 = arith.constant 5.000000e-01 : f32
    %62 = vector.broadcast %cst_42 : f32 to vector<32x128xf32>
    %63 = arith.mulf %62, %61 : vector<32x128xf32>
    %cst_43 = arith.constant 0.707106769 : f32
    %64 = vector.broadcast %cst_43 : f32 to vector<32x128xf32>
    %65 = arith.mulf %61, %64 : vector<32x128xf32>
    %66 = math.erf %65 : vector<32x128xf32>
    %cst_44 = arith.constant 1.000000e+00 : f32
    %67 = vector.broadcast %cst_44 : f32 to vector<32x128xf32>
    %68 = arith.addf %67, %66 : vector<32x128xf32>
    %69 = arith.mulf %63, %68 : vector<32x128xf32>
    %70 = vector.shape_cast %69 : vector<32x128xf32> to vector<2x16x128xf32>
    %cst_45 = arith.constant dense<0.000000e+00> : vector<2x128xf32>
    %71 = vector.multi_reduction <add>, %70, %cst_45 [1] : vector<2x16x128xf32> to vector<2x128xf32>
    %cst_46 = arith.constant dense<0.000000e+00> : vector<2x128xf32>
    %72 = tpu.matmul %71, %3, %cst_46 {dimension_numbers = #tpu.dot_dimension_numbers<[1], [0], [0], [1], [0, 0, 1, 1], [], []>} : vector<2x128xf32>, vector<128x128xf32>, vector<2x128xf32> -> vector<2x128xf32>
    %73 = arith.mulf %70, %70 : vector<2x16x128xf32>
    %cst_47 = arith.constant dense<0.000000e+00> : vector<2x128xf32>
    %74 = vector.multi_reduction <add>, %73, %cst_47 [1] : vector<2x16x128xf32> to vector<2x128xf32>
    %cst_48 = arith.constant dense<0.000000e+00> : vector<2x128xf32>
    %75 = tpu.matmul %74, %3, %cst_48 {dimension_numbers = #tpu.dot_dimension_numbers<[1], [0], [0], [1], [0, 0, 1, 1], [], []>} : vector<2x128xf32>, vector<128x128xf32>, vector<2x128xf32> -> vector<2x128xf32>
    %cst_49 = arith.constant 3.906250e-03 : f32
    %76 = vector.broadcast %cst_49 : f32 to vector<2x128xf32>
    %77 = arith.mulf %72, %76 : vector<2x128xf32>
    %cst_50 = arith.constant 3.906250e-03 : f32
    %78 = vector.broadcast %cst_50 : f32 to vector<2x128xf32>
    %79 = arith.mulf %75, %78 : vector<2x128xf32>
    %80 = arith.mulf %77, %77 : vector<2x128xf32>
    %81 = arith.subf %79, %80 : vector<2x128xf32>
    %cst_51 = arith.constant 0.000000e+00 : f32
    %82 = vector.broadcast %cst_51 : f32 to vector<2x128xf32>
    %83 = arith.maximumf %81, %82 : vector<2x128xf32>
    %cst_52 = arith.constant 9.99999974E-6 : f32
    %84 = vector.broadcast %cst_52 : f32 to vector<2x128xf32>
    %85 = arith.addf %83, %84 : vector<2x128xf32>
    %86 = math.rsqrt %85 : vector<2x128xf32>
    %87 = vector.shape_cast %77 : vector<2x128xf32> to vector<2x1x128xf32>
    %88 = vector.broadcast %87 : vector<2x1x128xf32> to vector<2x16x128xf32>
    %89 = arith.subf %70, %88 : vector<2x16x128xf32>
    %90 = vector.shape_cast %86 : vector<2x128xf32> to vector<2x1x128xf32>
    %91 = vector.broadcast %90 : vector<2x1x128xf32> to vector<2x16x128xf32>
    %92 = arith.mulf %89, %91 : vector<2x16x128xf32>
    %c0_53 = arith.constant 0 : index
    %c5_54 = arith.constant 5 : index
    %c0_55 = arith.constant 0 : index
    %93 = vector.load %arg8[%c0_53, %c5_54, %c0_55] : memref<2x26x128xf32, #tpu.memory_space<vmem>>, vector<2x16x128xf32>
    tpu.vector_store %arg8[%c0_53, %c5_54, %c0_55], %92 {strides = array<i32>} : memref<2x26x128xf32, #tpu.memory_space<vmem>>, vector<2x16x128xf32>,
    %c2_56 = arith.constant 2 : index
    %c0_57 = arith.constant 0 : index
    %94 = vector.load %arg5[%c2_56, %c0_57] : memref<3x128xf32, #tpu.memory_space<vmem>>, vector<1x128xf32>
    %c0_58 = arith.constant 0 : index
    %c0_59 = arith.constant 0 : index
    %c0_60 = arith.constant 0 : index
    %95 = vector.load %arg8[%c0_58, %c0_59, %c0_60] : memref<2x26x128xf32, #tpu.memory_space<vmem>>, vector<2x16x128xf32>
    %96 = vector.shape_cast %95 : vector<2x16x128xf32> to vector<32x128xf32>
    %c0_61 = arith.constant 0 : index
    %c5_62 = arith.constant 5 : index
    %c0_63 = arith.constant 0 : index
    %97 = vector.load %arg8[%c0_61, %c5_62, %c0_63] : memref<2x26x128xf32, #tpu.memory_space<vmem>>, vector<2x16x128xf32>
    %98 = vector.shape_cast %97 : vector<2x16x128xf32> to vector<32x128xf32>
    %c0_64 = arith.constant 0 : index
    %c10 = arith.constant 10 : index
    %c0_65 = arith.constant 0 : index
    %99 = vector.load %arg8[%c0_64, %c10, %c0_65] : memref<2x26x128xf32, #tpu.memory_space<vmem>>, vector<2x16x128xf32>
    %100 = vector.shape_cast %99 : vector<2x16x128xf32> to vector<32x128xf32>
    %101 = tpu.concatenate %96, %98, %100 in 1 : vector<32x128xf32>, vector<32x128xf32>, vector<32x128xf32> -> vector<32x384xf32>
    %102 = arith.truncf %101 : vector<32x384xf32> to vector<32x384xbf16>
    %c0_66 = arith.constant 0 : index
    %c0_67 = arith.constant 0 : index
    %103 = vector.load %arg4[%c0_66, %c0_67] : memref<384x128xbf16, #tpu.memory_space<vmem>>, vector<384x128xbf16>
    %cst_68 = arith.constant dense<0.000000e+00> : vector<32x128xf32>
    %104 = tpu.matmul %102, %103, %cst_68 {dimension_numbers = #tpu.dot_dimension_numbers<[1], [0], [0], [1], [0, 0, 1, 1], [], []>} : vector<32x384xbf16>, vector<384x128xbf16>, vector<32x128xf32> -> vector<32x128xf32>
    %105 = vector.broadcast %94 : vector<1x128xf32> to vector<32x128xf32>
    %106 = arith.addf %104, %105 : vector<32x128xf32>
    %cst_69 = arith.constant 5.000000e-01 : f32
    %107 = vector.broadcast %cst_69 : f32 to vector<32x128xf32>
    %108 = arith.mulf %107, %106 : vector<32x128xf32>
    %cst_70 = arith.constant 0.707106769 : f32
    %109 = vector.broadcast %cst_70 : f32 to vector<32x128xf32>
    %110 = arith.mulf %106, %109 : vector<32x128xf32>
    %111 = math.erf %110 : vector<32x128xf32>
    %cst_71 = arith.constant 1.000000e+00 : f32
    %112 = vector.broadcast %cst_71 : f32 to vector<32x128xf32>
    %113 = arith.addf %112, %111 : vector<32x128xf32>
    %114 = arith.mulf %108, %113 : vector<32x128xf32>
    %115 = vector.shape_cast %114 : vector<32x128xf32> to vector<2x16x128xf32>
    %cst_72 = arith.constant dense<0.000000e+00> : vector<2x128xf32>
    %116 = vector.multi_reduction <add>, %115, %cst_72 [1] : vector<2x16x128xf32> to vector<2x128xf32>
    %cst_73 = arith.constant dense<0.000000e+00> : vector<2x128xf32>
    %117 = tpu.matmul %116, %3, %cst_73 {dimension_numbers = #tpu.dot_dimension_numbers<[1], [0], [0], [1], [0, 0, 1, 1], [], []>} : vector<2x128xf32>, vector<128x128xf32>, vector<2x128xf32> -> vector<2x128xf32>
    %118 = arith.mulf %115, %115 : vector<2x16x128xf32>
    %cst_74 = arith.constant dense<0.000000e+00> : vector<2x128xf32>
    %119 = vector.multi_reduction <add>, %118, %cst_74 [1] : vector<2x16x128xf32> to vector<2x128xf32>
    %cst_75 = arith.constant dense<0.000000e+00> : vector<2x128xf32>
    %120 = tpu.matmul %119, %3, %cst_75 {dimension_numbers = #tpu.dot_dimension_numbers<[1], [0], [0], [1], [0, 0, 1, 1], [], []>} : vector<2x128xf32>, vector<128x128xf32>, vector<2x128xf32> -> vector<2x128xf32>
    %cst_76 = arith.constant 3.906250e-03 : f32
    %121 = vector.broadcast %cst_76 : f32 to vector<2x128xf32>
    %122 = arith.mulf %117, %121 : vector<2x128xf32>
    %cst_77 = arith.constant 3.906250e-03 : f32
    %123 = vector.broadcast %cst_77 : f32 to vector<2x128xf32>
    %124 = arith.mulf %120, %123 : vector<2x128xf32>
    %125 = arith.mulf %122, %122 : vector<2x128xf32>
    %126 = arith.subf %124, %125 : vector<2x128xf32>
    %cst_78 = arith.constant 0.000000e+00 : f32
    %127 = vector.broadcast %cst_78 : f32 to vector<2x128xf32>
    %128 = arith.maximumf %126, %127 : vector<2x128xf32>
    %cst_79 = arith.constant 9.99999974E-6 : f32
    %129 = vector.broadcast %cst_79 : f32 to vector<2x128xf32>
    %130 = arith.addf %128, %129 : vector<2x128xf32>
    %131 = math.rsqrt %130 : vector<2x128xf32>
    %132 = vector.shape_cast %122 : vector<2x128xf32> to vector<2x1x128xf32>
    %133 = vector.broadcast %132 : vector<2x1x128xf32> to vector<2x16x128xf32>
    %134 = arith.subf %115, %133 : vector<2x16x128xf32>
    %135 = vector.shape_cast %131 : vector<2x128xf32> to vector<2x1x128xf32>
    %136 = vector.broadcast %135 : vector<2x1x128xf32> to vector<2x16x128xf32>
    %137 = arith.mulf %134, %136 : vector<2x16x128xf32>
    %c0_80 = arith.constant 0 : index
    %c0_81 = arith.constant 0 : index
    %c0_82 = arith.constant 0 : index
    %138 = vector.load %arg7[%c0_80, %c0_81, %c0_82] : memref<2x16x128xf32, #tpu.memory_space<vmem>>, vector<2x16x128xf32>
    tpu.vector_store %arg7[%c0_80, %c0_81, %c0_82], %137 {strides = array<i32>} : memref<2x16x128xf32, #tpu.memory_space<vmem>>, vector<2x16x128xf32>,
    return
  }
  func.func @transform_0(%arg0: i32) -> (i32, i32, i32) {
    %c0_i32 = arith.constant 0 : i32
    %c0_i32_0 = arith.constant 0 : i32
    %c0_i32_1 = arith.constant 0 : i32
    return %arg0, %c0_i32, %c0_i32_0 : i32, i32, i32
  }
  func.func @transform_1(%arg0: i32) -> (i32, i32) {
    %c0_i32 = arith.constant 0 : i32
    %c0_i32_0 = arith.constant 0 : i32
    %c0_i32_1 = arith.constant 0 : i32
    return %c0_i32, %c0_i32_0 : i32, i32
  }
  func.func @transform_2(%arg0: i32) -> (i32, i32) {
    %c0_i32 = arith.constant 0 : i32
    %c0_i32_0 = arith.constant 0 : i32
    %c0_i32_1 = arith.constant 0 : i32
    return %c0_i32, %c0_i32_0 : i32, i32
  }
  func.func @transform_3(%arg0: i32) -> (i32, i32) {
    %c0_i32 = arith.constant 0 : i32
    %c0_i32_0 = arith.constant 0 : i32
    %c0_i32_1 = arith.constant 0 : i32
    return %c0_i32, %c0_i32_0 : i32, i32
  }
  func.func @transform_4(%arg0: i32) -> (i32, i32) {
    %c0_i32 = arith.constant 0 : i32
    %c0_i32_0 = arith.constant 0 : i32
    %c0_i32_1 = arith.constant 0 : i32
    return %c0_i32, %c0_i32_0 : i32, i32
  }
  func.func @transform_5(%arg0: i32) -> (i32, i32) {
    %c0_i32 = arith.constant 0 : i32
    %c0_i32_0 = arith.constant 0 : i32
    %c0_i32_1 = arith.constant 0 : i32
    return %c0_i32, %c0_i32_0 : i32, i32
  }
  func.func @transform_6(%arg0: i32) -> (i32, i32, i32) {
    %c0_i32 = arith.constant 0 : i32
    %c0_i32_0 = arith.constant 0 : i32
    %c0_i32_1 = arith.constant 0 : i32
    return %arg0, %c0_i32, %c0_i32_0 : i32, i32, i32
  }
}

</mosaic_0001>

<bundles_post_ra>
// kernel: tile.18
= control target key start
LH: loop header
LB: loop body
LE: loop exit
PB: predicated region body
PF: predicated region fallthrough
CT: control target
= control target key end

     0   :  { %s28_s0 = inlined_call_operand.vmem [shape: f32[8], index: 0, kind: input, shape index: {}]   ;;  %s29_s1 = inlined_call_operand.vmem [shape: f32[16,8], index: 1, kind: output, shape index: {}]  }
   0x1   :  { %v4_v0 = vld [vmem:[%s28_s0] ss:$0 sm:$0xff] }
   0x2   :  { %5 = vst [vmem:[%s29_s1] sm:$0xff] %v4_v0  ;;  %8 = vst [vmem:[%s29_s1 + $0x8] sm:$0xff] %v4_v0 }

// kernel: tile.27
= control target key start
LH: loop header
LB: loop body
LE: loop exit
PB: predicated region body
PF: predicated region fallthrough
CT: control target
= control target key end

     0   :  { %s131_s10 = smov 120   ;;  %s132_s11 = smov 104   ;;  %vm3_vm0 = vcmask 64512   ;;  %vm9_vm1 = vcmask 1048512   ;;  %vm15_vm2 = vcmask 982912   ;;  %vm21_vm3 = vcmask 917312   ;;  %s207_s0 = inlined_call_operand.vmem [shape: f32[16,8], index: 0, kind: input, shape index: {}]   ;;  %s208_s1 = inlined_call_operand.vmem [shape: f32[1,128], index: 1, kind: output, shape index: {}]  }
   0x1   :  { %v101_v0 = vld [vmem:[%s207_s0 + $0xf] sm:$0x1]   ;;  %v103_v1 = vld [vmem:[%s207_s0 + $0xd] sm:$0x1]   ;;  %v102_v2 = vld [vmem:[%s207_s0 + $0xe] sm:$0x1]  }
   0x2   :  { %7 = vrot.lane.b32.xlu0 %v101_v0, %s131_s10  ;;  %19 = vrot.lane.b32.xlu1 %v103_v1, %s132_s11  ;;  %v104_v3 = vld [vmem:[%s207_s0 + $0xc] sm:$0x1]   ;;  %s133_s16 = smov 112   ;;  %s134_s17 = smov 96   ;;  %v105_v4 = vld [vmem:[%s207_s0 + $0xb] sm:$0x1]  }
   0x3   :  { %v106_v5 = vld [vmem:[%s207_s0 + $0xa] sm:$0x1]   ;;  %v2_v6 = vld [vmem:[%s207_s0] sm:$0x1]   ;;  %s135_s24 = smov 88   ;;  %s136_s25 = smov 80  }
   0x4   :  { %4 = vst.msk [vmem:[#allocation0] sm:$0x1] %vm3_vm0, %v2_v6   ;;  %v107_v7 = vld [vmem:[%s207_s0 + $0x9] sm:$0x1]   ;;  %v108_v8 = vld [vmem:[%s207_s0 + $0x8] sm:$0x1]  }
   0x5   :  { %s137_s30 = smov 72   ;;  %s138_s2 = smov 64   ;;  %v109_v9 = vld [vmem:[%s207_s0 + $0x7] sm:$0x1]   ;;  %v110_v10 = vld [vmem:[%s207_s0 + $0x6] sm:$0x1]  }
   0x6   :  { %13 = vrot.lane.b32.xlu0 %v102_v2, %s133_s16  ;;  %25 = vrot.lane.b32.xlu1 %v104_v3, %s134_s17  ;;  %s139_s7 = smov 56   ;;  %s140_s8 = smov 48   ;;  %v111_v11 = vld [vmem:[%s207_s0 + $0x5] sm:$0x1]   ;;  %v112_v12 = vld [vmem:[%s207_s0 + $0x4] sm:$0x1]  }
   0x7   :  { %s141_s13 = smov 40   ;;  %s142_s14 = smov 32   ;;  %v113_v13 = vld [vmem:[%s207_s0 + $0x3] sm:$0x1]   ;;  %v114_v14 = vld [vmem:[%s207_s0 + $0x2] sm:$0x1]  }
   0x8   :  { %s143_s19 = smov 24   ;;  %s144_s20 = smov 16   ;;  %v115_v15 = vld [vmem:[%s207_s0 + $0x1] sm:$0x1]   ;;  %vm27_vm4 = vcmask 851712   ;;  %vm33_vm5 = vcmask 786112  }
   0x9   :  { %s145_s0 = smov 8   ;;  %vm39_vm6 = vcmask 720512   ;;  %vm45_vm7 = vcmask 654912   ;;  %vm51_vm8 = vcmask 589312   ;;  %vm57_vm9 = vcmask 523712  }
   0xa   :  { %31 = vrot.lane.b32.xlu0 %v105_v4, %s135_s24  ;;  %37 = vrot.lane.b32.xlu1 %v106_v5, %s136_s25  ;;  %vm63_vm10 = vcmask 458112   ;;  %vm69_vm11 = vcmask 392512   ;;  %vm75_vm12 = vcmask 326912   ;;  %vm81_vm13 = vcmask 261312  }
   0xb   :  { %vm87_vm14 = vcmask 195712   ;;  %vm93_vm15 = vcmask 130112  }
   0xe   :  { %43 = vrot.lane.b32.xlu0 %v107_v7, %s137_s30  ;;  %49 = vrot.lane.b32.xlu1 %v108_v8, %s138_s2 }
  0x12   :  { %55 = vrot.lane.b32.xlu0 %v109_v9, %s139_s7  ;;  %61 = vrot.lane.b32.xlu1 %v110_v10, %s140_s8 }
  0x16   :  { %67 = vrot.lane.b32.xlu0 %v111_v11, %s141_s13  ;;  %73 = vrot.lane.b32.xlu1 %v112_v12, %s142_s14 }
  0x1a   :  { %79 = vrot.lane.b32.xlu0 %v113_v13, %s143_s19  ;;  %85 = vrot.lane.b32.xlu1 %v114_v14, %s144_s20 }
  0x1e   :  { %91 = vrot.lane.b32.xlu0 %v115_v15, %s145_s0 }
  0x74   :  { %v8_v16 = vpop.permute.xlu0 %7   ;;  %v20_v17 = vpop.permute.xlu1 %19  }
  0x75   :  { %10 = vst.msk [vmem:[#allocation0] sm:$0x1] %vm9_vm1, %v8_v16  }
  0x78   :  { %v14_v18 = vpop.permute.xlu0 %13   ;;  %v26_v19 = vpop.permute.xlu1 %25  }
  0x79   :  { %16 = vst.msk [vmem:[#allocation0] sm:$0x1] %vm15_vm2, %v14_v18  }
  0x7a   :  { %22 = vst.msk [vmem:[#allocation0] sm:$0x1] %vm21_vm3, %v20_v17  }
  0x7b   :  { %28 = vst.msk [vmem:[#allocation0] sm:$0x1] %vm27_vm4, %v26_v19  }
  0x7c   :  { %v32_v20 = vpop.permute.xlu0 %31   ;;  %v38_v21 = vpop.permute.xlu1 %37  }
  0x7d   :  { %34 = vst.msk [vmem:[#allocation0] sm:$0x1] %vm33_vm5, %v32_v20  }
  0x7e   :  { %40 = vst.msk [vmem:[#allocation0] sm:$0x1] %vm39_vm6, %v38_v21  }
  0x80   :  { %v44_v22 = vpop.permute.xlu0 %43   ;;  %v50_v23 = vpop.permute.xlu1 %49  }
  0x81   :  { %46 = vst.msk [vmem:[#allocation0] sm:$0x1] %vm45_vm7, %v44_v22  }
  0x82   :  { %52 = vst.msk [vmem:[#allocation0] sm:$0x1] %vm51_vm8, %v50_v23  }
  0x84   :  { %v56_v24 = vpop.permute.xlu0 %55   ;;  %v62_v25 = vpop.permute.xlu1 %61  }
  0x85   :  { %58 = vst.msk [vmem:[#allocation0] sm:$0x1] %vm57_vm9, %v56_v24  }
  0x86   :  { %64 = vst.msk [vmem:[#allocation0] sm:$0x1] %vm63_vm10, %v62_v25  }
  0x88   :  { %v68_v26 = vpop.permute.xlu0 %67   ;;  %v74_v27 = vpop.permute.xlu1 %73  }
  0x89   :  { %70 = vst.msk [vmem:[#allocation0] sm:$0x1] %vm69_vm11, %v68_v26  }
  0x8a   :  { %76 = vst.msk [vmem:[#allocation0] sm:$0x1] %vm75_vm12, %v74_v27  }
  0x8c   :  { %v80_v28 = vpop.permute.xlu0 %79   ;;  %v86_v29 = vpop.permute.xlu1 %85  }
  0x8d   :  { %82 = vst.msk [vmem:[#allocation0] sm:$0x1] %vm81_vm13, %v80_v28  }
  0x8e   :  { %88 = vst.msk [vmem:[#allocation0] sm:$0x1] %vm87_vm14, %v86_v29  }
  0x90   :  { %v92_v30 = vpop.permute.xlu0 %91  }
  0x91   :  { %94 = vst.msk [vmem:[#allocation0] sm:$0x1] %vm93_vm15, %v92_v30  }
  0x98   :  { %v98_v31 = vld [vmem:[#allocation0] sm:$0x1] }
  0x99   :  { %100 = vst [vmem:[%s208_s1] sm:$0x1] %v98_v31 }

// kernel: dilation_block_forward.1
= control target key start
LH: loop header
LB: loop body
LE: loop exit
PB: predicated region body
PF: predicated region fallthrough
CT: control target
= control target key end

     0   :  { %v2654_v45 = vmov 0.0|0.0   ;;  %vm2655_vm0 = vmmov 0   ;;  %v2656_v63 = vmov 0.0   ;;  %vm393_vm1 = vcmask 1041409   ;;  %s3254_s1 = inlined_call_operand.vmem [shape: bf16[384,128], index: 1, kind: input, shape index: {}]   ;;  %s3255_s0 = inlined_call_operand.vmem [shape: f32[2,26,128], index: 0, kind: input, shape index: {}]   ;;  %s3256_s5 = inlined_call_operand.vmem [shape: f32[128,128], index: 5, kind: input, shape index: {}]   ;;  %s3257_s4 = inlined_call_operand.vmem [shape: f32[3,128], index: 4, kind: input, shape index: {}]   ;;  %s3258_s2 = inlined_call_operand.vmem [shape: bf16[384,128], index: 2, kind: input, shape index: {}]   ;;  %s3259_s3 = inlined_call_operand.vmem [shape: bf16[384,128], index: 3, kind: input, shape index: {}]   ;;  %s3260_s6 = inlined_call_operand.vmem [shape: f32[2,16,128], index: 6, kind: output, shape index: {}]  }
   0x1   :  { %v2552_v0 = vld [vmem:[%s3254_s1 + $0x40] sm:$0xff]   ;;  %v2554_v2 = vld [vmem:[%s3254_s1 + $0x48] sm:$0xff]   ;;  %v2557_v5 = vld [vmem:[%s3254_s1 + $0x50] sm:$0xff]   ;;  %24 = vst [vmem:[#allocation2] sm:$0x1f] %v2656_v63 }
   0x2   :  { %v2553_v1 = vld [vmem:[%s3254_s1] sm:$0xff]   ;;  %1918 = vmatprep.subr.bf16.mxu0 %v2552_v0  ;;  %v2556_v4 = vld [vmem:[%s3254_s1 + $0x8] sm:$0xff]   ;;  %v2559_v7 = vld [vmem:[%s3254_s1 + $0x10] sm:$0xff]   ;;  %25 = vst [vmem:[#allocation2 + $0x20] sm:$0x1f] %v2656_v63 }
   0x3   :  { %1919 = vmatpush3.bf16.msra.mxu0 %v2553_v1  ;;  %v2555_v3 = vld [vmem:[%s3254_s1 + $0x80] sm:$0xff]   ;;  %v2558_v6 = vld [vmem:[%s3254_s1 + $0x88] sm:$0xff]   ;;  %v2560_v8 = vld [vmem:[%s3254_s1 + $0x58] sm:$0xff]   ;;  %26 = vst [vmem:[#allocation2 + $0x15] sm:$0x1f] %v2656_v63 }
   0x4   :  { %1920 = vmatprep.subr.bf16.mxu0 %v2554_v2  ;;  %2134 = vmatprep.subr.bf16.mxu1 %v2555_v3  ;;  %v2561_v9 = vld [vmem:[%s3254_s1 + $0x90] sm:$0xff]   ;;  %v2562_v10 = vld [vmem:[%s3254_s1 + $0x18] sm:$0xff]   ;;  %v2563_v11 = vld [vmem:[%s3254_s1 + $0x60] sm:$0xff]   ;;  %27 = vst [vmem:[#allocation2 + $0x35] sm:$0x1f] %v2656_v63 }
   0x5   :  { %2135 = vmatpush3.bf16.msra.mxu1 %v2555_v3  ;;  %v2564_v12 = vld [vmem:[%s3254_s1 + $0x98] sm:$0xff]   ;;  %v2565_v13 = vld [vmem:[%s3254_s1 + $0x20] sm:$0xff]   ;;  %v2566_v15 = vld [vmem:[%s3254_s1 + $0x68] sm:$0xff]  }
   0x6   :  { %2136 = vmatprep.subr.bf16.mxu1 %v2558_v6  ;;  %v2567_v14 = vld [vmem:[%s3254_s1 + $0xa0] sm:$0xff]   ;;  %v2568_v16 = vld [vmem:[%s3254_s1 + $0x28] sm:$0xff]   ;;  %v2569_v18 = vld [vmem:[%s3254_s1 + $0x70] sm:$0xff]  }
   0x7   :  { %1921 = vmatpush3.bf16.msra.mxu0 %v2556_v4  ;;  %v2570_v17 = vld [vmem:[%s3254_s1 + $0xa8] sm:$0xff]   ;;  %v2571_v19 = vld [vmem:[%s3254_s1 + $0x30] sm:$0xff]   ;;  %v2572_v23 = vld [vmem:[%s3254_s1 + $0x78] sm:$0xff]  }
   0x8   :  { %1922 = vmatprep.subr.bf16.mxu0 %v2557_v5  ;;  %v2573_v20 = vld [vmem:[%s3254_s1 + $0xb0] sm:$0xff]   ;;  %v49_v21 = vld [vmem:[%s3255_s0 + $0x5] sm:$0xff]  ;;  %v2574_v27 = vld [vmem:[%s3254_s1 + $0x38] sm:$0xff]  }
   0x9   :  { %2137 = vmatpush3.bf16.msra.mxu1 %v2558_v6  ;;  %v50_v22 = vld [vmem:[%s3255_s0 + $0xd] sm:$0xff]  ;;  %v45_v29 = vld [vmem:[%s3255_s0 + $0x4] sm:$0xff]  ;;  %v2575_v31 = vld [vmem:[%s3254_s1 + $0xb8] sm:$0xff]  }
   0xa   :  { %2138 = vmatprep.subr.bf16.mxu1 %v2561_v9  ;;  %v58_v24 = vpack.c.bf16 %v50_v22, %v49_v21  ;;  %v53_v25 = vld [vmem:[%s3255_s0 + $0x6] sm:$0xff]  ;;  %v54_v26 = vld [vmem:[%s3255_s0 + $0xe] sm:$0xff]  ;;  %v31_v47 = vld [vmem:[%s3256_s5 + $0x18] sm:$0xff] }
   0xb   :  { %1923 = vmatpush3.bf16.msra.mxu0 %v2559_v7  ;;  %v59_v28 = vpack.c.bf16 %v54_v26, %v53_v25  ;;  %v46_v30 = vld [vmem:[%s3255_s0 + $0xc] sm:$0xff]  ;;  %v47_v39 = vld [vmem:[%s3255_s0 + $0x24] sm:$0xff]  ;;  %v35_v53 = vld [vmem:[%s3256_s5 + $0x38] sm:$0xff] }
   0xc   :  { %1924 = vmatprep.subr.bf16.mxu0 %v2560_v8  ;;  %291 = vmatprep.mubr.bf16.mxu0 %v58_v24  ;;  %v51_v32 = vld [vmem:[%s3255_s0 + $0x25] sm:$0xff]  ;;  %v52_v33 = vld [vmem:[%s3255_s0 + $0x2d] sm:$0xff]  ;;  %v57_v34 = vpack.c.bf16 %v46_v30, %v45_v29  ;;  %v39_v59 = vld [vmem:[%s3256_s5 + $0x58] sm:$0xff] }
   0xd   :  { %2139 = vmatpush3.bf16.msra.mxu1 %v2561_v9  ;;  %2150 = vmatprep.mubr.bf16.mxu1 %v59_v28  ;;  %v55_v35 = vld [vmem:[%s3255_s0 + $0x26] sm:$0xff]  ;;  %v56_v36 = vld [vmem:[%s3255_s0 + $0x2e] sm:$0xff]  ;;  %v61_v37 = vpack.c.bf16 %v52_v33, %v51_v32  ;;  %v43_v2 = vld [vmem:[%s3256_s5 + $0x78] sm:$0xff] }
   0xe   :  { %2140 = vmatprep.subr.bf16.mxu1 %v2564_v12  ;;  %v62_v38 = vpack.c.bf16 %v56_v36, %v55_v35  ;;  %v48_v40 = vld [vmem:[%s3255_s0 + $0x2c] sm:$0xff]  ;;  %v28_v42 = vld [vmem:[%s3256_s5] sm:$0xff] }
   0xf   :  { %1925 = vmatpush3.bf16.msra.mxu0 %v2562_v10  ;;  %v60_v41 = vpack.c.bf16 %v48_v40, %v47_v39  ;;  %v29_v43 = vld [vmem:[%s3256_s5 + $0x8] sm:$0xff]  ;;  %v30_v46 = vld [vmem:[%s3256_s5 + $0x10] sm:$0xff]  ;;  %v32_v49 = vld [vmem:[%s3256_s5 + $0x20] sm:$0xff] }
  0x10   :  { %1926 = vmatprep.subr.bf16.mxu0 %v2563_v11  ;;  %v2807_v44 = vpack.c.bf16 %v29_v43, %v28_v42  ;;  %v2821_v48 = vpack.c.bf16 %v31_v47, %v30_v46  ;;  %v33_v50 = vld [vmem:[%s3256_s5 + $0x28] sm:$0xff]  ;;  %v34_v52 = vld [vmem:[%s3256_s5 + $0x30] sm:$0xff]  ;;  %v36_v55 = vld [vmem:[%s3256_s5 + $0x40] sm:$0xff] }
  0x11   :  { %2141 = vmatpush3.bf16.msra.mxu1 %v2564_v12  ;;  %v2833_v51 = vpack.c.bf16 %v33_v50, %v32_v49  ;;  %v2845_v54 = vpack.c.bf16 %v35_v53, %v34_v52  ;;  %v37_v56 = vld [vmem:[%s3256_s5 + $0x48] sm:$0xff]  ;;  %v38_v58 = vld [vmem:[%s3256_s5 + $0x50] sm:$0xff]  ;;  %v40_v61 = vld [vmem:[%s3256_s5 + $0x60] sm:$0xff] }
  0x12   :  { %2142 = vmatprep.subr.bf16.mxu1 %v2567_v14  ;;  %v2857_v57 = vpack.c.bf16 %v37_v56, %v36_v55  ;;  %v2869_v60 = vpack.c.bf16 %v39_v59, %v38_v58  ;;  %v41_v62 = vld [vmem:[%s3256_s5 + $0x68] sm:$0xff]  ;;  %v42_v1 = vld [vmem:[%s3256_s5 + $0x70] sm:$0xff]  ;;  %v1843_v6 = vld [vmem:[%s3257_s4] ss:$0 sm:$0xff] }
  0x13   :  { %1927 = vmatpush3.bf16.msra.mxu0 %v2565_v13  ;;  %v2887_v0 = vpack.c.bf16 %v41_v62, %v40_v61  ;;  %v2899_v3 = vpack.c.bf16 %v43_v2, %v42_v1 }
  0x14   :  { %1928 = vmatprep.subr.bf16.mxu0 %v2566_v15 }
  0x15   :  { %2143 = vmatpush3.bf16.msra.mxu1 %v2567_v14 }
  0x16   :  { %2144 = vmatprep.subr.bf16.mxu1 %v2570_v17 }
  0x17   :  { %1929 = vmatpush3.bf16.msra.mxu0 %v2568_v16 }
  0x18   :  { %1930 = vmatprep.subr.bf16.mxu0 %v2569_v18 }
  0x19   :  { %2145 = vmatpush3.bf16.msra.mxu1 %v2570_v17 }
  0x1a   :  { %2146 = vmatprep.subr.bf16.mxu1 %v2573_v20 }
  0x1b   :  { %1931 = vmatpush3.bf16.msra.mxu0 %v2571_v19 }
  0x1c   :  { %1932 = vmatprep.subr.bf16.mxu0 %v2572_v23 }
  0x1d   :  { %2147 = vmatpush3.bf16.msra.mxu1 %v2573_v20 }
  0x1e   :  { %2148 = vmatprep.subr.bf16.mxu1 %v2575_v31 }
  0x1f   :  { %1933 = vmatpush3.bf16.msra.mxu0 %v2574_v27 }
  0x20   :  { %2404 = vmatprep.subr.bf16.mxu0 %v2654_v45 }
  0x21   :  { %2149 = vmatpush3.bf16.msra.mxu1 %v2575_v31 }
  0x22   :  { %292 = vmatmul.mubr.bf16.vlgmr.msra.gmra.mrb[0].mxu0 %v57_v34  ;;  %2428 = vmatprep.subr.bf16.mxu1 %v2654_v45 }
  0x23   :  { %299 = vmatprep.mubr.bf16.mxu0 %v61_v37  ;;  %2406 = vmatpush3.bf16.msra.mxu0 %v2807_v44 }
  0x24   :  { %2151 = vmatmul.mubr.bf16.vlgmr.msra.gmra.mrb[0].mxu1 %v62_v38  ;;  %2407 = vmatprep.subr.bf16.mxu0 %v2654_v45 }
  0x25   :  { %2430 = vmatpush3.bf16.msra.mxu1 %v2807_v44  ;;  %2221 = vmatprep.mubr.msk.f32.mxu1 %vm2655_vm0, %v2656_v63 }
  0x26   :  { %2431 = vmatprep.subr.bf16.mxu1 %v2654_v45 }
  0x27   :  { %2409 = vmatpush3.bf16.msra.mxu0 %v2821_v48 }
  0x28   :  { %2410 = vmatprep.subr.bf16.mxu0 %v2654_v45 }
  0x29   :  { %2433 = vmatpush3.bf16.msra.mxu1 %v2821_v48 }
  0x2a   :  { %300 = vmatmul.mubr.bf16.gmra.mrb[4].mxu0 %v60_v41  ;;  %2434 = vmatprep.subr.bf16.mxu1 %v2654_v45 }
  0x2b   :  { %2412 = vmatpush3.bf16.msra.mxu0 %v2833_v51  ;;  %2186 = vmatprep.mubr.msk.f32.mxu0 %vm2655_vm0, %v2656_v63 }
  0x2c   :  { %2413 = vmatprep.subr.bf16.mxu0 %v2654_v45 }
  0x2d   :  { %2436 = vmatpush3.bf16.msra.mxu1 %v2833_v51 }
  0x2e   :  { %2437 = vmatprep.subr.bf16.mxu1 %v2654_v45 }
  0x2f   :  { %2415 = vmatpush3.bf16.msra.mxu0 %v2845_v54 }
  0x30   :  { %2416 = vmatprep.subr.bf16.mxu0 %v2654_v45 }
  0x31   :  { %2439 = vmatpush3.bf16.msra.mxu1 %v2845_v54 }
  0x32   :  { %2440 = vmatprep.subr.bf16.mxu1 %v2654_v45 }
  0x33   :  { %2418 = vmatpush3.bf16.msra.mxu0 %v2857_v57 }
  0x34   :  { %2419 = vmatprep.subr.bf16.mxu0 %v2654_v45 }
  0x35   :  { %2442 = vmatpush3.bf16.msra.mxu1 %v2857_v57 }
  0x36   :  { %2443 = vmatprep.subr.bf16.mxu1 %v2654_v45 }
  0x37   :  { %2421 = vmatpush3.bf16.msra.mxu0 %v2869_v60 }
  0x38   :  { %2422 = vmatprep.subr.bf16.mxu0 %v2654_v45 }
  0x39   :  { %2445 = vmatpush3.bf16.msra.mxu1 %v2869_v60 }
  0x3a   :  { %2446 = vmatprep.subr.bf16.mxu1 %v2654_v45 }
  0x3b   :  { %2424 = vmatpush3.bf16.msra.mxu0 %v2887_v0 }
  0x3c   :  { %2425 = vmatprep.subr.bf16.mxu0 %v2654_v45 }
  0x3d   :  { %2448 = vmatpush3.bf16.msra.mxu1 %v2887_v0 }
  0x3e   :  { %2449 = vmatprep.subr.bf16.mxu1 %v2654_v45 }
  0x3f   :  { %2427 = vmatpush3.bf16.msra.mxu0 %v2899_v3 }
  0x41   :  { %2451 = vmatpush3.bf16.msra.mxu1 %v2899_v3 }
  0xf5   :  { %v1934_v4 = vpop.f32.mrb[0].mxu0 }
  0xf6   :  { %v1935_v5 = vpop.f32.mrb[1].mxu0 }
  0xf7   :  { %v1936_v7 = vadd.f32 %v1935_v5, %v1934_v4  ;;  %v1937_v8 = vpop.f32.mrb[2].mxu0  ;;  %v2152_v10 = vpop.f32.mrb[0].mxu1 }
  0xf8   :  { %v1938_v9 = vpop.f32.mrb[3].mxu0  ;;  %v342_v13 = vpop.f32.mrb[1].mxu1 }
  0xf9   :  { %v1939_v11 = vadd.f32 %v1938_v9, %v1937_v8  ;;  %v294_v12 = vadd.f32 %v1936_v7, %v1843_v6  ;;  %v2153_v14 = vpop.f32.mrb[2].mxu1 }
  0xfa   :  { %v345_v17 = vpop.f32.mrb[3].mxu1 }
  0xfb   :  { %v343_v15 = vadd.f32 %v342_v13, %v294_v12  ;;  %v297_v16 = vadd.f32 %v1939_v11, %v1843_v6 }
  0xfd   :  { %v361_v18 = vmul.f32 0.70710677, %v343_v15  ;;  %v346_v19 = vadd.f32 %v345_v17, %v297_v16  ;;  %v1940_v20 = vpop.f32.mrb[4].mxu0  ;;  %v357_v34 = vmul.f32 0.5, %v343_v15 }
  0xfe   :  { %v1941_v21 = vpop.f32.mrb[5].mxu0 }
  0xff   :  { %2624 = verf.f32 %v361_v18  ;;  %v362_v22 = vmul.f32 0.70710677, %v346_v19  ;;  %v1942_v23 = vadd.f32 %v1941_v21, %v1940_v20  ;;  %v1943_v24 = vpop.f32.mrb[6].mxu0  ;;  %v358_v38 = vmul.f32 0.5, %v346_v19 }
 0x100   :  { %v1944_v25 = vpop.f32.mrb[7].mxu0 }
 0x101   :  { %2626 = verf.f32 %v362_v22  ;;  %v302_v26 = vadd.f32 %v1942_v23, %v1843_v6  ;;  %v1945_v27 = vadd.f32 %v1944_v25, %v1943_v24 }
 0x103   :  { %v351_v28 = vadd.f32 %v2152_v10, %v302_v26  ;;  %v305_v29 = vadd.f32 %v1945_v27, %v1843_v6 }
 0x105   :  { %v363_v30 = vmul.f32 0.70710677, %v351_v28  ;;  %v354_v31 = vadd.f32 %v2153_v14, %v305_v29  ;;  %v359_v50 = vmul.f32 0.5, %v351_v28  ;;  %v2576_v29 = vld [vmem:[%s3258_s2 + $0x40] sm:$0xff]  }
 0x106   :  { %1990 = vmatprep.subr.bf16.mxu0 %v2576_v29 }
 0x107   :  { %2628 = verf.f32 %v363_v30  ;;  %v364_v32 = vmul.f32 0.70710677, %v354_v31  ;;  %v360_v55 = vmul.f32 0.5, %v354_v31  ;;  %v2577_v30 = vld [vmem:[%s3258_s2] sm:$0xff]  }
 0x108   :  { %v2578_v31 = vld [vmem:[%s3258_s2 + $0x80] sm:$0xff]  }
 0x109   :  { %v2625_v33 = vpop.eup %2624  ;;  %2630 = verf.f32 %v364_v32  ;;  %2224 = vmatprep.subr.bf16.mxu1 %v2578_v31  ;;  %v2579_v32 = vld [vmem:[%s3258_s2 + $0x48] sm:$0xff]  }
 0x10a   :  { %v369_v35 = vadd.f32 1.0, %v2625_v33  ;;  %v2580_v33 = vld [vmem:[%s3258_s2 + $0x8] sm:$0xff]  }
 0x10b   :  { %v2627_v36 = vpop.eup %2626 }
 0x10c   :  { %v2908_v37 = vmul.f32 %v369_v35, %v357_v34  ;;  %v370_v39 = vadd.f32 1.0, %v2627_v36  ;;  %v2581_v34 = vld [vmem:[%s3258_s2 + $0x88] sm:$0xff]   ;;  %v2582_v35 = vld [vmem:[%s3258_s2 + $0x50] sm:$0xff]  }
 0x10d   :  { %v2583_v36 = vld [vmem:[%s3258_s2 + $0x10] sm:$0xff]  }
 0x10e   :  { %v2910_v40 = vmul.f32 %v370_v39, %v358_v38  ;;  %v466_v41 = vmul.f32 %v2908_v37, %v2908_v37  ;;  %v2584_v38 = vld [vmem:[%s3258_s2 + $0x90] sm:$0xff]   ;;  %v2585_v39 = vld [vmem:[%s3258_s2 + $0x58] sm:$0xff]  }
 0x110   :  { %v377_v42 = vadd.f32 %v2910_v40, %v2908_v37  ;;  %v467_v43 = vmul.f32 %v2910_v40, %v2910_v40 }
 0x111   :  { %v2629_v46 = vpop.eup %2628 }
 0x112   :  { %v378_v47 = vrot.slane %v377_v42, 4  ;;  %v470_v49 = vadd.f32 %v467_v43, %v466_v41  ;;  %v371_v52 = vadd.f32 1.0, %v2629_v46  ;;  %v2586_v41 = vld [vmem:[%s3258_s2 + $0x18] sm:$0xff]   ;;  %v2588_v43 = vld [vmem:[%s3258_s2 + $0x60] sm:$0xff]  }
 0x113   :  { %v2631_v53 = vpop.eup %2630  ;;  %v2589_v46 = vld [vmem:[%s3258_s2 + $0x20] sm:$0xff]  }
 0x114   :  { %v379_v56 = vadd.f32 %v378_v47, %v377_v42  ;;  %v471_v58 = vrot.slane %v470_v49, 4  ;;  %v2918_v59 = vmul.f32 %v371_v52, %v359_v50  ;;  %v372_v61 = vadd.f32 1.0, %v2631_v53  ;;  %v2587_v42 = vld [vmem:[%s3258_s2 + $0x98] sm:$0xff]   ;;  %v2590_v47 = vld [vmem:[%s3258_s2 + $0xa0] sm:$0xff]   ;;  %v2592_v50 = vld [vmem:[%s3258_s2 + $0x28] sm:$0xff]  }
 0x115   :  { %v2593_v52 = vld [vmem:[%s3258_s2 + $0xa8] sm:$0xff]   ;;  %v2594_v53 = vld [vmem:[%s3258_s2 + $0x70] sm:$0xff]  }
 0x116   :  { %v2920_v62 = vmul.f32 %v372_v61, %v360_v55  ;;  %v472_v1 = vadd.f32 %v471_v58, %v470_v49  ;;  %v380_v2 = vrot.slane %v379_v56, 2  ;;  %v468_v4 = vmul.f32 %v2918_v59, %v2918_v59  ;;  %v2591_v49 = vld [vmem:[%s3258_s2 + $0x68] sm:$0xff]   ;;  %v2595_v55 = vld [vmem:[%s3258_s2 + $0x30] sm:$0xff]   ;;  %v2597_v58 = vld [vmem:[%s3258_s2 + $0x78] sm:$0xff]  }
 0x117   :  { %v2598_v61 = vld [vmem:[%s3258_s2 + $0x38] sm:$0xff]  }
 0x118   :  { %v384_v5 = vadd.f32 %v2920_v62, %v2918_v59  ;;  %v469_v6 = vmul.f32 %v2920_v62, %v2920_v62  ;;  %v473_v8 = vrot.slane %v472_v1, 2  ;;  %v381_v10 = vadd.f32 %v380_v2, %v379_v56  ;;  %v2596_v56 = vld [vmem:[%s3258_s2 + $0xb0] sm:$0xff]  }
 0x119   :  { %v2657_v2 = vmov 1966171168  }
 0x11a   :  { %v385_v7 = vrot.slane %v384_v5, 4  ;;  %v477_v9 = vadd.f32 %v469_v6, %v468_v4  ;;  %v474_v14 = vadd.f32 %v473_v8, %v472_v1  ;;  %v382_v16 = vrot.slane %v381_v10, 1  ;;  %v2599_v1 = vld [vmem:[%s3258_s2 + $0xb8] sm:$0xff]  }
 0x11b   :  { %v567_v4 = vunpack.c.l.s4 %v2657_v2 }
 0x11c   :  { %v386_v11 = vadd.f32 %v385_v7, %v384_v5  ;;  %v478_v12 = vrot.slane %v477_v9, 4  ;;  %v475_v20 = vrot.slane %v474_v14, 1  ;;  %v383_v22 = vadd.f32 %v382_v16, %v381_v10 }
 0x11d   :  { %v569_v5 = vlaneseq }
 0x11e   :  { %v387_v13 = vrot.slane %v386_v11, 2  ;;  %v479_v15 = vadd.f32 %v478_v12, %v477_v9  ;;  %v476_v26 = vadd.f32 %v475_v20, %v474_v14 }
 0x11f   :  { %v570_v12 = vshrl.u32 %v569_v5, 7 }
 0x120   :  { %v388_v17 = vadd.f32 %v387_v13, %v386_v11  ;;  %v480_v18 = vrot.slane %v479_v15, 2  ;;  %v568_v11 = vunpack.c.0.s8 %v567_v4  ;;  %v1868_v4 = vld [vmem:[%s3257_s4 + $0x1] ss:$0 sm:$0xff] }
 0x122   :  { %v389_v19 = vrot.slane %v388_v17, 1  ;;  %v481_v21 = vadd.f32 %v480_v18, %v479_v15  ;;  %v3004_v16 = vsub.s32 %v568_v11, %v570_v12 }
 0x124   :  { %v390_v23 = vadd.f32 %v389_v19, %v388_v17  ;;  %v482_v24 = vrot.slane %v481_v21, 1 }
 0x126   :  { %v394_v25 = vsel %vm393_vm1, %v390_v23, %v383_v22  ;;  %v483_v27 = vadd.f32 %v482_v24, %v481_v21  ;;  %v3008_v22 = vsub.s32 0, %v570_v12 }
 0x127   :  { %2187 = vmatmul.mubr.f32.vlgmr.msra.gmra.mrb[8].mxu0 %v394_v25 }
 0x128   :  { %v486_v28 = vsel %vm393_vm1, %v483_v27, %v476_v26  ;;  %1991 = vmatpush3.bf16.msra.mxu0 %v2577_v30 }
 0x129   :  { %2222 = vmatmul.mubr.f32.vlgmr.msra.gmra.mrb[4].mxu1 %v486_v28  ;;  %1992 = vmatprep.subr.bf16.mxu0 %v2579_v32 }
 0x12a   :  { %2225 = vmatpush3.bf16.msra.mxu1 %v2578_v31 }
 0x12b   :  { %2226 = vmatprep.subr.bf16.mxu1 %v2581_v34 }
 0x12c   :  { %1993 = vmatpush3.bf16.msra.mxu0 %v2580_v33 }
 0x12d   :  { %1994 = vmatprep.subr.bf16.mxu0 %v2582_v35 }
 0x12e   :  { %2227 = vmatpush3.bf16.msra.mxu1 %v2581_v34 }
 0x12f   :  { %2228 = vmatprep.subr.bf16.mxu1 %v2584_v38 }
 0x130   :  { %1995 = vmatpush3.bf16.msra.mxu0 %v2583_v36 }
 0x131   :  { %1996 = vmatprep.subr.bf16.mxu0 %v2585_v39 }
 0x132   :  { %2229 = vmatpush3.bf16.msra.mxu1 %v2584_v38 }
 0x133   :  { %2230 = vmatprep.subr.bf16.mxu1 %v2587_v42 }
 0x134   :  { %1997 = vmatpush3.bf16.msra.mxu0 %v2586_v41 }
 0x135   :  { %1998 = vmatprep.subr.bf16.mxu0 %v2588_v43 }
 0x136   :  { %2231 = vmatpush3.bf16.msra.mxu1 %v2587_v42 }
 0x137   :  { %2232 = vmatprep.subr.bf16.mxu1 %v2590_v47 }
 0x138   :  { %1999 = vmatpush3.bf16.msra.mxu0 %v2589_v46 }
 0x139   :  { %2000 = vmatprep.subr.bf16.mxu0 %v2591_v49 }
 0x13a   :  { %2233 = vmatpush3.bf16.msra.mxu1 %v2590_v47 }
 0x13b   :  { %2234 = vmatprep.subr.bf16.mxu1 %v2593_v52 }
 0x13c   :  { %2001 = vmatpush3.bf16.msra.mxu0 %v2592_v50 }
 0x13d   :  { %2002 = vmatprep.subr.bf16.mxu0 %v2594_v53 }
 0x13e   :  { %2235 = vmatpush3.bf16.msra.mxu1 %v2593_v52 }
 0x13f   :  { %2236 = vmatprep.subr.bf16.mxu1 %v2596_v56 }
 0x140   :  { %2003 = vmatpush3.bf16.msra.mxu0 %v2595_v55 }
 0x141   :  { %2004 = vmatprep.subr.bf16.mxu0 %v2597_v58 }
 0x142   :  { %2237 = vmatpush3.bf16.msra.mxu1 %v2596_v56 }
 0x143   :  { %2238 = vmatprep.subr.bf16.mxu1 %v2599_v1 }
 0x144   :  { %2005 = vmatpush3.bf16.msra.mxu0 %v2598_v61 }
 0x145   :  { %2452 = vmatprep.subr.bf16.mxu0 %v2654_v45 }
 0x146   :  { %2239 = vmatpush3.bf16.msra.mxu1 %v2599_v1 }
 0x147   :  { %2476 = vmatprep.subr.bf16.mxu1 %v2654_v45 }
 0x1fa   :  { %v462_v6 = vpop.f32.mrb[8].mxu0 }
 0x1fb   :  { %v558_v7 = vmul.f32 0.00390625, %v462_v6  ;;  %v2188_v8 = vpop.f32.mrb[9].mxu0 }
 0x1fc   :  { %v554_v9 = vpop.f32.mrb[4].mxu1 }
 0x1fd   :  { %v560_v10 = vmul.f32 %v558_v7, %v558_v7  ;;  %v559_v13 = vmul.f32 0.00390625, %v554_v9  ;;  %v2223_v14 = vpop.f32.mrb[5].mxu1  ;;  %v572_v19 = vrot.slane %v558_v7, %v3004_v16 }
 0x1ff   :  { %v561_v15 = vsub.f32 %v559_v13, %v560_v10  ;;  %v573_v20 = vcombine.high %v572_v19, %v572_v19  ;;  %v580_v21 = vrot.slane %v572_v19, %v3004_v16 }
 0x201   :  { %v562_v17 = vmax.f32 %v561_v15, 0.0  ;;  %v587_v23 = vrot.slane %v573_v20, %v3004_v16  ;;  %v591_v25 = vrot.slane %v580_v21, %v3008_v22 }
 0x203   :  { %v563_v18 = vadd.f32 1e-05, %v562_v17  ;;  %v595_v27 = vrot.slane %v587_v23, %v3008_v22  ;;  %v598_v30 = vsub.f32 %v2908_v37, %v591_v25  ;;  %v599_v31 = vsub.f32 %v2910_v40, %v591_v25 }
 0x205   :  { %2632 = vrsqrt.f32 %v563_v18  ;;  %v600_v34 = vsub.f32 %v2918_v59, %v595_v27  ;;  %v601_v35 = vsub.f32 %v2920_v62, %v595_v27 }
 0x20f   :  { %v2633_v24 = vpop.eup %2632 }
 0x210   :  { %v609_v26 = vrot.slane %v2633_v24, %v3004_v16 }
 0x212   :  { %v610_v28 = vcombine.high %v609_v26, %v609_v26  ;;  %v617_v29 = vrot.slane %v609_v26, %v3004_v16 }
 0x214   :  { %v624_v32 = vrot.slane %v610_v28, %v3004_v16  ;;  %v628_v33 = vrot.slane %v617_v29, %v3008_v22 }
 0x216   :  { %v632_v36 = vrot.slane %v624_v32, %v3008_v22  ;;  %v635_v38 = vmul.f32 %v628_v33, %v598_v30  ;;  %v636_v39 = vmul.f32 %v628_v33, %v599_v31 }
 0x218   :  { %v637_v41 = vmul.f32 %v632_v36, %v600_v34  ;;  %v638_v42 = vmul.f32 %v632_v36, %v601_v35  ;;  %639 = vst [vmem:[#allocation2 + $0x5] sm:$0xff] %v635_v38  ;;  %640 = vst [vmem:[#allocation2 + $0xd] sm:$0xff] %v636_v39  ;;  %v657_v43 = vpack.c.bf16 %v636_v39, %v635_v38 }
 0x21a   :  { %641 = vst [vmem:[#allocation2 + $0x25] sm:$0xff] %v637_v41  ;;  %642 = vst [vmem:[#allocation2 + $0x2d] sm:$0xff] %v638_v42  ;;  %890 = vmatprep.mubr.bf16.mxu0 %v657_v43  ;;  %v660_v37 = vpack.c.bf16 %v638_v42, %v637_v41 }
 0x21f   :  { %v652_v40 = vld [vmem:[#allocation2 + $0x8] sm:$0xff]  ;;  %v653_v46 = vld [vmem:[#allocation2 + $0x10] sm:$0xff] }
 0x220   :  { %v644_v47 = vld [vmem:[#allocation2 + $0x2] sm:$0xff]  ;;  %v658_v49 = vpack.c.bf16 %v653_v46, %v652_v40  ;;  %v645_v59 = vld [vmem:[#allocation2 + $0xa] sm:$0xff] }
 0x221   :  { %v656_v50 = vpack.c.bf16 %v645_v59, %v644_v47  ;;  %v654_v62 = vld [vmem:[#allocation2 + $0x28] sm:$0xff]  ;;  %v655_v52 = vld [vmem:[#allocation2 + $0x30] sm:$0xff] }
 0x222   :  { %2240 = vmatprep.mubr.bf16.mxu1 %v658_v49  ;;  %v661_v53 = vpack.c.bf16 %v655_v52, %v654_v62  ;;  %v646_v55 = vld [vmem:[#allocation2 + $0x22] sm:$0xff]  ;;  %v647_v56 = vld [vmem:[#allocation2 + $0x2a] sm:$0xff] }
 0x223   :  { %891 = vmatmul.mubr.bf16.vlgmr.msra.gmra.mrb[12].mxu0 %v656_v50  ;;  %v659_v58 = vpack.c.bf16 %v647_v56, %v646_v55 }
 0x224   :  { %898 = vmatprep.mubr.bf16.mxu0 %v660_v37  ;;  %2241 = vmatmul.mubr.bf16.vlgmr.msra.gmra.mrb[8].mxu1 %v661_v53 }
 0x225   :  { %2454 = vmatpush3.bf16.msra.mxu0 %v2807_v44  ;;  %2478 = vmatpush3.bf16.msra.mxu1 %v2807_v44 }
 0x226   :  { %2455 = vmatprep.subr.bf16.mxu0 %v2654_v45  ;;  %2479 = vmatprep.subr.bf16.mxu1 %v2654_v45 }
 0x227   :  { %2311 = vmatprep.mubr.msk.f32.mxu1 %vm2655_vm0, %v2656_v63 }
 0x229   :  { %2457 = vmatpush3.bf16.msra.mxu0 %v2821_v48  ;;  %2481 = vmatpush3.bf16.msra.mxu1 %v2821_v48 }
 0x22a   :  { %2458 = vmatprep.subr.bf16.mxu0 %v2654_v45  ;;  %2482 = vmatprep.subr.bf16.mxu1 %v2654_v45 }
 0x22b   :  { %899 = vmatmul.mubr.bf16.gmra.mrb[16].mxu0 %v659_v58 }
 0x22c   :  { %2276 = vmatprep.mubr.msk.f32.mxu0 %vm2655_vm0, %v2656_v63 }
 0x22d   :  { %2460 = vmatpush3.bf16.msra.mxu0 %v2833_v51  ;;  %2484 = vmatpush3.bf16.msra.mxu1 %v2833_v51 }
 0x22e   :  { %2461 = vmatprep.subr.bf16.mxu0 %v2654_v45  ;;  %2485 = vmatprep.subr.bf16.mxu1 %v2654_v45 }
 0x231   :  { %2463 = vmatpush3.bf16.msra.mxu0 %v2845_v54  ;;  %2487 = vmatpush3.bf16.msra.mxu1 %v2845_v54 }
 0x232   :  { %2464 = vmatprep.subr.bf16.mxu0 %v2654_v45  ;;  %2488 = vmatprep.subr.bf16.mxu1 %v2654_v45 }
 0x235   :  { %2466 = vmatpush3.bf16.msra.mxu0 %v2857_v57  ;;  %2490 = vmatpush3.bf16.msra.mxu1 %v2857_v57 }
 0x236   :  { %2467 = vmatprep.subr.bf16.mxu0 %v2654_v45  ;;  %2491 = vmatprep.subr.bf16.mxu1 %v2654_v45 }
 0x239   :  { %2469 = vmatpush3.bf16.msra.mxu0 %v2869_v60  ;;  %2493 = vmatpush3.bf16.msra.mxu1 %v2869_v60 }
 0x23a   :  { %2470 = vmatprep.subr.bf16.mxu0 %v2654_v45  ;;  %2494 = vmatprep.subr.bf16.mxu1 %v2654_v45 }
 0x23d   :  { %2472 = vmatpush3.bf16.msra.mxu0 %v2887_v0  ;;  %2496 = vmatpush3.bf16.msra.mxu1 %v2887_v0 }
 0x23e   :  { %2473 = vmatprep.subr.bf16.mxu0 %v2654_v45  ;;  %2497 = vmatprep.subr.bf16.mxu1 %v2654_v45 }
 0x241   :  { %2475 = vmatpush3.bf16.msra.mxu0 %v2899_v3  ;;  %2499 = vmatpush3.bf16.msra.mxu1 %v2899_v3 }
 0x2f6   :  { %v2006_v61 = vpop.f32.mrb[12].mxu0 }
 0x2f7   :  { %v2007_v1 = vpop.f32.mrb[13].mxu0  ;;  %v2242_v2 = vpop.f32.mrb[8].mxu1 }
 0x2f8   :  { %v2008_v5 = vadd.f32 %v2007_v1, %v2006_v61  ;;  %v2009_v6 = vpop.f32.mrb[14].mxu0  ;;  %v941_v7 = vpop.f32.mrb[9].mxu1 }
 0x2f9   :  { %v2010_v8 = vpop.f32.mrb[15].mxu0  ;;  %v2243_v9 = vpop.f32.mrb[10].mxu1 }
 0x2fa   :  { %v893_v10 = vadd.f32 %v2008_v5, %v1868_v4  ;;  %v2011_v11 = vadd.f32 %v2010_v8, %v2009_v6  ;;  %v944_v12 = vpop.f32.mrb[11].mxu1 }
 0x2fc   :  { %v942_v13 = vadd.f32 %v941_v7, %v893_v10  ;;  %v896_v14 = vadd.f32 %v2011_v11, %v1868_v4 }
 0x2fe   :  { %v960_v15 = vmul.f32 0.70710677, %v942_v13  ;;  %v945_v17 = vadd.f32 %v944_v12, %v896_v14  ;;  %v2012_v18 = vpop.f32.mrb[16].mxu0  ;;  %v956_v33 = vmul.f32 0.5, %v942_v13 }
 0x2ff   :  { %v2013_v19 = vpop.f32.mrb[17].mxu0 }
 0x300   :  { %2634 = verf.f32 %v960_v15  ;;  %v961_v20 = vmul.f32 0.70710677, %v945_v17  ;;  %v2014_v21 = vadd.f32 %v2013_v19, %v2012_v18  ;;  %v2015_v23 = vpop.f32.mrb[18].mxu0  ;;  %v957_v38 = vmul.f32 0.5, %v945_v17 }
 0x301   :  { %v2016_v24 = vpop.f32.mrb[19].mxu0 }
 0x302   :  { %2636 = verf.f32 %v961_v20  ;;  %v901_v25 = vadd.f32 %v2014_v21, %v1868_v4  ;;  %v2017_v26 = vadd.f32 %v2016_v24, %v2015_v23 }
 0x304   :  { %v950_v27 = vadd.f32 %v2242_v2, %v901_v25  ;;  %v904_v28 = vadd.f32 %v2017_v26, %v1868_v4 }
 0x306   :  { %v962_v29 = vmul.f32 0.70710677, %v950_v27  ;;  %v953_v30 = vadd.f32 %v2243_v9, %v904_v28  ;;  %v958_v49 = vmul.f32 0.5, %v950_v27 }
 0x308   :  { %2638 = verf.f32 %v962_v29  ;;  %v963_v31 = vmul.f32 0.70710677, %v953_v30  ;;  %v959_v62 = vmul.f32 0.5, %v953_v30  ;;  %v2600_v30 = vld [vmem:[%s3259_s3 + $0x40] sm:$0xff]  }
 0x309   :  { %2062 = vmatprep.subr.bf16.mxu0 %v2600_v30 }
 0x30a   :  { %v2635_v32 = vpop.eup %2634  ;;  %2640 = verf.f32 %v963_v31  ;;  %v2601_v31 = vld [vmem:[%s3259_s3] sm:$0xff]  }
 0x30b   :  { %v968_v34 = vadd.f32 1.0, %v2635_v32  ;;  %v2602_v32 = vld [vmem:[%s3259_s3 + $0x80] sm:$0xff]  }
 0x30c   :  { %v2637_v35 = vpop.eup %2636  ;;  %2314 = vmatprep.subr.bf16.mxu1 %v2602_v32 }
 0x30d   :  { %v3059_v36 = vmul.f32 %v968_v34, %v956_v33  ;;  %v969_v39 = vadd.f32 1.0, %v2637_v35  ;;  %v2603_v33 = vld [vmem:[%s3259_s3 + $0x48] sm:$0xff]  }
 0x30e   :  { %v2604_v34 = vld [vmem:[%s3259_s3 + $0x8] sm:$0xff]  }
 0x30f   :  { %v3061_v41 = vmul.f32 %v969_v39, %v957_v38  ;;  %v1064_v42 = vmul.f32 %v3059_v36, %v3059_v36  ;;  %v2605_v35 = vld [vmem:[%s3259_s3 + $0x88] sm:$0xff]   ;;  %v2606_v38 = vld [vmem:[%s3259_s3 + $0x50] sm:$0xff]  }
 0x310   :  { %v2607_v39 = vld [vmem:[%s3259_s3 + $0x10] sm:$0xff]  }
 0x311   :  { %v976_v43 = vadd.f32 %v3061_v41, %v3059_v36  ;;  %v1065_v37 = vmul.f32 %v3061_v41, %v3061_v41 }
 0x312   :  { %v2639_v40 = vpop.eup %2638 }
 0x313   :  { %v977_v46 = vrot.slane %v976_v43, 4  ;;  %v1068_v47 = vadd.f32 %v1065_v37, %v1064_v42  ;;  %v970_v59 = vadd.f32 1.0, %v2639_v40  ;;  %v2608_v42 = vld [vmem:[%s3259_s3 + $0x90] sm:$0xff]   ;;  %v2610_v37 = vld [vmem:[%s3259_s3 + $0x18] sm:$0xff]  }
 0x314   :  { %v2641_v50 = vpop.eup %2640  ;;  %v2611_v40 = vld [vmem:[%s3259_s3 + $0x98] sm:$0xff]  }
 0x315   :  { %v978_v52 = vadd.f32 %v977_v46, %v976_v43  ;;  %v1069_v53 = vrot.slane %v1068_v47, 4  ;;  %v3069_v55 = vmul.f32 %v970_v59, %v958_v49  ;;  %v971_v56 = vadd.f32 1.0, %v2641_v50  ;;  %v2609_v43 = vld [vmem:[%s3259_s3 + $0x58] sm:$0xff]   ;;  %v2612_v46 = vld [vmem:[%s3259_s3 + $0x60] sm:$0xff]   ;;  %v2615_v59 = vld [vmem:[%s3259_s3 + $0x68] sm:$0xff]  }
 0x316   :  { %v2614_v49 = vld [vmem:[%s3259_s3 + $0xa0] sm:$0xff]   ;;  %v2616_v50 = vld [vmem:[%s3259_s3 + $0x28] sm:$0xff]  }
 0x317   :  { %v3071_v58 = vmul.f32 %v971_v56, %v959_v62  ;;  %v1070_v61 = vadd.f32 %v1069_v53, %v1068_v47  ;;  %v979_v1 = vrot.slane %v978_v52, 2  ;;  %v1066_v2 = vmul.f32 %v3069_v55, %v3069_v55  ;;  %v2613_v47 = vld [vmem:[%s3259_s3 + $0x20] sm:$0xff]   ;;  %v2617_v62 = vld [vmem:[%s3259_s3 + $0xa8] sm:$0xff]   ;;  %v2619_v53 = vld [vmem:[%s3259_s3 + $0x30] sm:$0xff]  }
 0x318   :  { %v2620_v56 = vld [vmem:[%s3259_s3 + $0xb0] sm:$0xff]  }
 0x319   :  { %v983_v4 = vadd.f32 %v3071_v58, %v3069_v55  ;;  %v1067_v5 = vmul.f32 %v3071_v58, %v3071_v58  ;;  %v1071_v7 = vrot.slane %v1070_v61, 2  ;;  %v980_v9 = vadd.f32 %v979_v1, %v978_v52  ;;  %v2618_v52 = vld [vmem:[%s3259_s3 + $0x70] sm:$0xff]   ;;  %v2622_v1 = vld [vmem:[%s3259_s3 + $0x38] sm:$0xff]  }
 0x31b   :  { %v984_v6 = vrot.slane %v983_v4, 4  ;;  %v1075_v8 = vadd.f32 %v1067_v5, %v1066_v2  ;;  %v1072_v13 = vadd.f32 %v1071_v7, %v1070_v61  ;;  %v981_v15 = vrot.slane %v980_v9, 1  ;;  %v2621_v61 = vld [vmem:[%s3259_s3 + $0x78] sm:$0xff]  }
 0x31c   :  { %v2623_v2 = vld [vmem:[%s3259_s3 + $0xb8] sm:$0xff]  }
 0x31d   :  { %v985_v10 = vadd.f32 %v984_v6, %v983_v4  ;;  %v1076_v11 = vrot.slane %v1075_v8, 4  ;;  %v1073_v20 = vrot.slane %v1072_v13, 1  ;;  %v982_v23 = vadd.f32 %v981_v15, %v980_v9 }
 0x31f   :  { %v986_v12 = vrot.slane %v985_v10, 2  ;;  %v1077_v14 = vadd.f32 %v1076_v11, %v1075_v8  ;;  %v1074_v27 = vadd.f32 %v1073_v20, %v1072_v13 }
 0x321   :  { %v987_v17 = vadd.f32 %v986_v12, %v985_v10  ;;  %v1078_v18 = vrot.slane %v1077_v14, 2 }
 0x323   :  { %v988_v19 = vrot.slane %v987_v17, 1  ;;  %v1079_v21 = vadd.f32 %v1078_v18, %v1077_v14 }
 0x325   :  { %v989_v24 = vadd.f32 %v988_v19, %v987_v17  ;;  %v1080_v25 = vrot.slane %v1079_v21, 1 }
 0x327   :  { %v992_v26 = vsel %vm393_vm1, %v989_v24, %v982_v23  ;;  %v1081_v28 = vadd.f32 %v1080_v25, %v1079_v21 }
 0x328   :  { %2277 = vmatmul.mubr.f32.vlgmr.msra.gmra.mrb[10].mxu0 %v992_v26 }
 0x329   :  { %v1084_v29 = vsel %vm393_vm1, %v1081_v28, %v1074_v27  ;;  %2063 = vmatpush3.bf16.msra.mxu0 %v2601_v31 }
 0x32a   :  { %2312 = vmatmul.mubr.f32.vlgmr.msra.gmra.mrb[6].mxu1 %v1084_v29  ;;  %2064 = vmatprep.subr.bf16.mxu0 %v2603_v33 }
 0x32b   :  { %2315 = vmatpush3.bf16.msra.mxu1 %v2602_v32 }
 0x32c   :  { %2316 = vmatprep.subr.bf16.mxu1 %v2605_v35 }
 0x32d   :  { %2065 = vmatpush3.bf16.msra.mxu0 %v2604_v34 }
 0x32e   :  { %2066 = vmatprep.subr.bf16.mxu0 %v2606_v38 }
 0x32f   :  { %2317 = vmatpush3.bf16.msra.mxu1 %v2605_v35 }
 0x330   :  { %2318 = vmatprep.subr.bf16.mxu1 %v2608_v42 }
 0x331   :  { %2067 = vmatpush3.bf16.msra.mxu0 %v2607_v39 }
 0x332   :  { %2068 = vmatprep.subr.bf16.mxu0 %v2609_v43 }
 0x333   :  { %2319 = vmatpush3.bf16.msra.mxu1 %v2608_v42 }
 0x334   :  { %2320 = vmatprep.subr.bf16.mxu1 %v2611_v40 }
 0x335   :  { %2069 = vmatpush3.bf16.msra.mxu0 %v2610_v37 }
 0x336   :  { %2070 = vmatprep.subr.bf16.mxu0 %v2612_v46 }
 0x337   :  { %2321 = vmatpush3.bf16.msra.mxu1 %v2611_v40 }
 0x338   :  { %2322 = vmatprep.subr.bf16.mxu1 %v2614_v49 }
 0x339   :  { %2071 = vmatpush3.bf16.msra.mxu0 %v2613_v47 }
 0x33a   :  { %2072 = vmatprep.subr.bf16.mxu0 %v2615_v59 }
 0x33b   :  { %2323 = vmatpush3.bf16.msra.mxu1 %v2614_v49 }
 0x33c   :  { %2324 = vmatprep.subr.bf16.mxu1 %v2617_v62 }
 0x33d   :  { %2073 = vmatpush3.bf16.msra.mxu0 %v2616_v50 }
 0x33e   :  { %2074 = vmatprep.subr.bf16.mxu0 %v2618_v52 }
 0x33f   :  { %2325 = vmatpush3.bf16.msra.mxu1 %v2617_v62 }
 0x340   :  { %2326 = vmatprep.subr.bf16.mxu1 %v2620_v56 }
 0x341   :  { %2075 = vmatpush3.bf16.msra.mxu0 %v2619_v53 }
 0x342   :  { %2076 = vmatprep.subr.bf16.mxu0 %v2621_v61 }
 0x343   :  { %2327 = vmatpush3.bf16.msra.mxu1 %v2620_v56 }
 0x344   :  { %2328 = vmatprep.subr.bf16.mxu1 %v2623_v2 }
 0x345   :  { %2077 = vmatpush3.bf16.msra.mxu0 %v2622_v1 }
 0x346   :  { %2500 = vmatprep.subr.bf16.mxu0 %v2654_v45 }
 0x347   :  { %2329 = vmatpush3.bf16.msra.mxu1 %v2623_v2 }
 0x348   :  { %2524 = vmatprep.subr.bf16.mxu1 %v2654_v45 }
 0x3fb   :  { %v1060_v4 = vpop.f32.mrb[10].mxu0 }
 0x3fc   :  { %v1156_v5 = vmul.f32 0.00390625, %v1060_v4  ;;  %v2278_v6 = vpop.f32.mrb[11].mxu0 }
 0x3fd   :  { %v1152_v7 = vpop.f32.mrb[6].mxu1 }
 0x3fe   :  { %v1158_v8 = vmul.f32 %v1156_v5, %v1156_v5  ;;  %v1157_v9 = vmul.f32 0.00390625, %v1152_v7  ;;  %v2313_v10 = vpop.f32.mrb[7].mxu1  ;;  %v1170_v14 = vrot.slane %v1156_v5, %v3004_v16 }
 0x400   :  { %v1159_v11 = vsub.f32 %v1157_v9, %v1158_v8  ;;  %v1171_v15 = vcombine.high %v1170_v14, %v1170_v14  ;;  %v1178_v17 = vrot.slane %v1170_v14, %v3004_v16 }
 0x402   :  { %v1160_v12 = vmax.f32 %v1159_v11, 0.0  ;;  %v1185_v18 = vrot.slane %v1171_v15, %v3004_v16  ;;  %v1189_v20 = vrot.slane %v1178_v17, %v3008_v22 }
 0x404   :  { %v1161_v13 = vadd.f32 1e-05, %v1160_v12  ;;  %v1193_v23 = vrot.slane %v1185_v18, %v3008_v22  ;;  %v1196_v26 = vsub.f32 %v3059_v36, %v1189_v20  ;;  %v1197_v27 = vsub.f32 %v3061_v41, %v1189_v20 }
 0x406   :  { %2642 = vrsqrt.f32 %v1161_v13  ;;  %v1198_v30 = vsub.f32 %v3069_v55, %v1193_v23  ;;  %v1199_v31 = vsub.f32 %v3071_v58, %v1193_v23 }
 0x410   :  { %v2643_v19 = vpop.eup %2642 }
 0x411   :  { %v1207_v21 = vrot.slane %v2643_v19, %v3004_v16 }
 0x413   :  { %v1208_v24 = vcombine.high %v1207_v21, %v1207_v21  ;;  %v1215_v25 = vrot.slane %v1207_v21, %v3004_v16 }
 0x415   :  { %v1222_v28 = vrot.slane %v1208_v24, %v3004_v16  ;;  %v1226_v29 = vrot.slane %v1215_v25, %v3008_v22 }
 0x417   :  { %v1230_v32 = vrot.slane %v1222_v28, %v3008_v22  ;;  %v1233_v33 = vmul.f32 %v1226_v29, %v1196_v26  ;;  %v1234_v34 = vmul.f32 %v1226_v29, %v1197_v27 }
 0x419   :  { %v1235_v35 = vmul.f32 %v1230_v32, %v1198_v30  ;;  %v1236_v38 = vmul.f32 %v1230_v32, %v1199_v31  ;;  %1237 = vst [vmem:[#allocation2 + $0x5] sm:$0xff] %v1233_v33  ;;  %1238 = vst [vmem:[#allocation2 + $0xd] sm:$0xff] %v1234_v34  ;;  %v1255_v39 = vpack.c.bf16 %v1234_v34, %v1233_v33 }
 0x41b   :  { %1239 = vst [vmem:[#allocation2 + $0x25] sm:$0xff] %v1235_v35  ;;  %1240 = vst [vmem:[#allocation2 + $0x2d] sm:$0xff] %v1236_v38  ;;  %1488 = vmatprep.mubr.bf16.mxu0 %v1255_v39  ;;  %v1258_v36 = vpack.c.bf16 %v1236_v38, %v1235_v35 }
 0x420   :  { %v1250_v41 = vld [vmem:[#allocation2 + $0xa] sm:$0xff]  ;;  %v1251_v42 = vld [vmem:[#allocation2 + $0x12] sm:$0xff]  ;;  %v1242_v43 = vld [vmem:[#allocation2] sm:$0xff] }
 0x421   :  { %v1256_v37 = vpack.c.bf16 %v1251_v42, %v1250_v41  ;;  %v1243_v55 = vld [vmem:[#allocation2 + $0x8] sm:$0xff] }
 0x422   :  { %v1254_v40 = vpack.c.bf16 %v1243_v55, %v1242_v43  ;;  %v1252_v58 = vld [vmem:[#allocation2 + $0x2a] sm:$0xff]  ;;  %v1253_v46 = vld [vmem:[#allocation2 + $0x32] sm:$0xff]  ;;  %v1244_v49 = vld [vmem:[#allocation2 + $0x20] sm:$0xff] }
 0x423   :  { %2330 = vmatprep.mubr.bf16.mxu1 %v1256_v37  ;;  %v1259_v47 = vpack.c.bf16 %v1253_v46, %v1252_v58  ;;  %v1245_v59 = vld [vmem:[#allocation2 + $0x28] sm:$0xff] }
 0x424   :  { %1489 = vmatmul.mubr.bf16.vlgmr.msra.gmra.mrb[20].mxu0 %v1254_v40  ;;  %v1257_v50 = vpack.c.bf16 %v1245_v59, %v1244_v49 }
 0x425   :  { %1496 = vmatprep.mubr.bf16.mxu0 %v1258_v36  ;;  %2331 = vmatmul.mubr.bf16.vlgmr.msra.gmra.mrb[12].mxu1 %v1259_v47 }
 0x426   :  { %2502 = vmatpush3.bf16.msra.mxu0 %v2807_v44  ;;  %2526 = vmatpush3.bf16.msra.mxu1 %v2807_v44 }
 0x427   :  { %2503 = vmatprep.subr.bf16.mxu0 %v2654_v45  ;;  %2527 = vmatprep.subr.bf16.mxu1 %v2654_v45 }
 0x428   :  { %2401 = vmatprep.mubr.msk.f32.mxu1 %vm2655_vm0, %v2656_v63 }
 0x42a   :  { %2505 = vmatpush3.bf16.msra.mxu0 %v2821_v48  ;;  %2529 = vmatpush3.bf16.msra.mxu1 %v2821_v48 }
 0x42b   :  { %2506 = vmatprep.subr.bf16.mxu0 %v2654_v45  ;;  %2530 = vmatprep.subr.bf16.mxu1 %v2654_v45 }
 0x42c   :  { %1497 = vmatmul.mubr.bf16.gmra.mrb[24].mxu0 %v1257_v50 }
 0x42d   :  { %2366 = vmatprep.mubr.msk.f32.mxu0 %vm2655_vm0, %v2656_v63 }
 0x42e   :  { %2508 = vmatpush3.bf16.msra.mxu0 %v2833_v51  ;;  %2532 = vmatpush3.bf16.msra.mxu1 %v2833_v51 }
 0x42f   :  { %2509 = vmatprep.subr.bf16.mxu0 %v2654_v45  ;;  %2533 = vmatprep.subr.bf16.mxu1 %v2654_v45 }
 0x432   :  { %2511 = vmatpush3.bf16.msra.mxu0 %v2845_v54  ;;  %2535 = vmatpush3.bf16.msra.mxu1 %v2845_v54  ;;  %v1893_v54 = vld [vmem:[%s3257_s4 + $0x2] ss:$0 sm:$0xff] }
 0x433   :  { %2512 = vmatprep.subr.bf16.mxu0 %v2654_v45  ;;  %2536 = vmatprep.subr.bf16.mxu1 %v2654_v45 }
 0x436   :  { %2514 = vmatpush3.bf16.msra.mxu0 %v2857_v57  ;;  %2538 = vmatpush3.bf16.msra.mxu1 %v2857_v57 }
 0x437   :  { %2515 = vmatprep.subr.bf16.mxu0 %v2654_v45  ;;  %2539 = vmatprep.subr.bf16.mxu1 %v2654_v45 }
 0x43a   :  { %2517 = vmatpush3.bf16.msra.mxu0 %v2869_v60  ;;  %2541 = vmatpush3.bf16.msra.mxu1 %v2869_v60 }
 0x43b   :  { %2518 = vmatprep.subr.bf16.mxu0 %v2654_v45  ;;  %2542 = vmatprep.subr.bf16.mxu1 %v2654_v45 }
 0x43e   :  { %2520 = vmatpush3.bf16.msra.mxu0 %v2887_v0  ;;  %2544 = vmatpush3.bf16.msra.mxu1 %v2887_v0 }
 0x43f   :  { %2521 = vmatprep.subr.bf16.mxu0 %v2654_v45  ;;  %2545 = vmatprep.subr.bf16.mxu1 %v2654_v45 }
 0x442   :  { %2523 = vmatpush3.bf16.msra.mxu0 %v2899_v3  ;;  %2547 = vmatpush3.bf16.msra.mxu1 %v2899_v3 }
 0x4f7   :  { %v2078_v44 = vpop.f32.mrb[20].mxu0 }
 0x4f8   :  { %v2079_v48 = vpop.f32.mrb[21].mxu0  ;;  %v2332_v51 = vpop.f32.mrb[12].mxu1 }
 0x4f9   :  { %v2080_v57 = vadd.f32 %v2079_v48, %v2078_v44  ;;  %v2081_v60 = vpop.f32.mrb[22].mxu0  ;;  %v1539_v63 = vpop.f32.mrb[13].mxu1 }
 0x4fa   :  { %v2082_v62 = vpop.f32.mrb[23].mxu0  ;;  %v2333_v0 = vpop.f32.mrb[14].mxu1 }
 0x4fb   :  { %v1491_v52 = vadd.f32 %v2080_v57, %v1893_v54  ;;  %v2083_v53 = vadd.f32 %v2082_v62, %v2081_v60  ;;  %v1542_v56 = vpop.f32.mrb[15].mxu1 }
 0x4fd   :  { %v1540_v45 = vadd.f32 %v1539_v63, %v1491_v52  ;;  %v1494_v61 = vadd.f32 %v2083_v53, %v1893_v54 }
 0x4ff   :  { %v1558_v1 = vmul.f32 0.70710677, %v1540_v45  ;;  %v1543_v2 = vadd.f32 %v1542_v56, %v1494_v61  ;;  %v2084_v3 = vpop.f32.mrb[24].mxu0  ;;  %v1554_v18 = vmul.f32 0.5, %v1540_v45 }
 0x500   :  { %v2085_v4 = vpop.f32.mrb[25].mxu0 }
 0x501   :  { %2644 = verf.f32 %v1558_v1  ;;  %v1559_v5 = vmul.f32 0.70710677, %v1543_v2  ;;  %v2086_v6 = vadd.f32 %v2085_v4, %v2084_v3  ;;  %v2087_v7 = vpop.f32.mrb[26].mxu0  ;;  %v1555_v23 = vmul.f32 0.5, %v1543_v2 }
 0x502   :  { %v2088_v8 = vpop.f32.mrb[27].mxu0 }
 0x503   :  { %2646 = verf.f32 %v1559_v5  ;;  %v1499_v9 = vadd.f32 %v2086_v6, %v1893_v54  ;;  %v2089_v10 = vadd.f32 %v2088_v8, %v2087_v7 }
 0x505   :  { %v1548_v11 = vadd.f32 %v2332_v51, %v1499_v9  ;;  %v1502_v12 = vadd.f32 %v2089_v10, %v1893_v54 }
 0x507   :  { %v1560_v13 = vmul.f32 0.70710677, %v1548_v11  ;;  %v1551_v14 = vadd.f32 %v2333_v0, %v1502_v12  ;;  %v1556_v32 = vmul.f32 0.5, %v1548_v11 }
 0x509   :  { %2648 = verf.f32 %v1560_v13  ;;  %v1561_v15 = vmul.f32 0.70710677, %v1551_v14  ;;  %v1557_v35 = vmul.f32 0.5, %v1551_v14 }
 0x50b   :  { %v2645_v17 = vpop.eup %2644  ;;  %2650 = verf.f32 %v1561_v15 }
 0x50c   :  { %v1566_v19 = vadd.f32 1.0, %v2645_v17 }
 0x50d   :  { %v2647_v20 = vpop.eup %2646 }
 0x50e   :  { %v3206_v21 = vmul.f32 %v1566_v19, %v1554_v18  ;;  %v1567_v24 = vadd.f32 1.0, %v2647_v20 }
 0x510   :  { %v3208_v25 = vmul.f32 %v1567_v24, %v1555_v23  ;;  %v1662_v26 = vmul.f32 %v3206_v21, %v3206_v21 }
 0x512   :  { %v1574_v27 = vadd.f32 %v3208_v25, %v3206_v21  ;;  %v1663_v28 = vmul.f32 %v3208_v25, %v3208_v25 }
 0x513   :  { %v2649_v29 = vpop.eup %2648 }
 0x514   :  { %v1575_v30 = vrot.slane %v1574_v27, 4  ;;  %v1666_v31 = vadd.f32 %v1663_v28, %v1662_v26  ;;  %v1568_v33 = vadd.f32 1.0, %v2649_v29 }
 0x515   :  { %v2651_v34 = vpop.eup %2650 }
 0x516   :  { %v1576_v38 = vadd.f32 %v1575_v30, %v1574_v27  ;;  %v1667_v39 = vrot.slane %v1666_v31, 4  ;;  %v3216_v36 = vmul.f32 %v1568_v33, %v1556_v32  ;;  %v1569_v41 = vadd.f32 1.0, %v2651_v34 }
 0x518   :  { %v3218_v42 = vmul.f32 %v1569_v41, %v1557_v35  ;;  %v1668_v43 = vadd.f32 %v1667_v39, %v1666_v31  ;;  %v1577_v37 = vrot.slane %v1576_v38, 2  ;;  %v1664_v55 = vmul.f32 %v3216_v36, %v3216_v36 }
 0x51a   :  { %v1581_v40 = vadd.f32 %v3218_v42, %v3216_v36  ;;  %v1665_v58 = vmul.f32 %v3218_v42, %v3218_v42  ;;  %v1669_v47 = vrot.slane %v1668_v43, 2  ;;  %v1578_v59 = vadd.f32 %v1577_v37, %v1576_v38 }
 0x51c   :  { %v1582_v46 = vrot.slane %v1581_v40, 4  ;;  %v1673_v49 = vadd.f32 %v1665_v58, %v1664_v55  ;;  %v1670_v51 = vadd.f32 %v1669_v47, %v1668_v43  ;;  %v1579_v57 = vrot.slane %v1578_v59, 1 }
 0x51e   :  { %v1583_v50 = vadd.f32 %v1582_v46, %v1581_v40  ;;  %v1674_v44 = vrot.slane %v1673_v49, 4  ;;  %v1671_v0 = vrot.slane %v1670_v51, 1  ;;  %v1580_v53 = vadd.f32 %v1579_v57, %v1578_v59 }
 0x520   :  { %v1584_v48 = vrot.slane %v1583_v50, 2  ;;  %v1675_v54 = vadd.f32 %v1674_v44, %v1673_v49  ;;  %v1672_v1 = vadd.f32 %v1671_v0, %v1670_v51 }
 0x522   :  { %v1585_v60 = vadd.f32 %v1584_v48, %v1583_v50  ;;  %v1676_v63 = vrot.slane %v1675_v54, 2 }
 0x524   :  { %v1586_v62 = vrot.slane %v1585_v60, 1  ;;  %v1677_v52 = vadd.f32 %v1676_v63, %v1675_v54 }
 0x526   :  { %v1587_v56 = vadd.f32 %v1586_v62, %v1585_v60  ;;  %v1678_v45 = vrot.slane %v1677_v52, 1 }
 0x528   :  { %v1590_v61 = vsel %vm393_vm1, %v1587_v56, %v1580_v53  ;;  %v1679_v2 = vadd.f32 %v1678_v45, %v1677_v52 }
 0x529   :  { %2367 = vmatmul.mubr.f32.vlgmr.msra.gmra.mrb[28].mxu0 %v1590_v61 }
 0x52a   :  { %v1682_v3 = vsel %vm393_vm1, %v1679_v2, %v1672_v1 }
 0x52b   :  { %2402 = vmatmul.mubr.f32.vlgmr.msra.gmra.mrb[16].mxu1 %v1682_v3 }
 0x5fc   :  { %v1658_v4 = vpop.f32.mrb[28].mxu0 }
 0x5fd   :  { %v1754_v5 = vmul.f32 0.00390625, %v1658_v4  ;;  %v2368_v6 = vpop.f32.mrb[29].mxu0 }
 0x5fe   :  { %v1750_v7 = vpop.f32.mrb[16].mxu1 }
 0x5ff   :  { %v1756_v8 = vmul.f32 %v1754_v5, %v1754_v5  ;;  %v1755_v9 = vmul.f32 0.00390625, %v1750_v7  ;;  %v2403_v10 = vpop.f32.mrb[17].mxu1  ;;  %v1768_v14 = vrot.slane %v1754_v5, %v3004_v16 }
 0x601   :  { %v1757_v11 = vsub.f32 %v1755_v9, %v1756_v8  ;;  %v1769_v15 = vcombine.high %v1768_v14, %v1768_v14  ;;  %v1776_v17 = vrot.slane %v1768_v14, %v3004_v16 }
 0x603   :  { %v1758_v12 = vmax.f32 %v1757_v11, 0.0  ;;  %v1783_v18 = vrot.slane %v1769_v15, %v3004_v16  ;;  %v1787_v20 = vrot.slane %v1776_v17, %v3008_v22 }
 0x605   :  { %v1759_v13 = vadd.f32 1e-05, %v1758_v12  ;;  %v1791_v24 = vrot.slane %v1783_v18, %v3008_v22  ;;  %v1794_v28 = vsub.f32 %v3206_v21, %v1787_v20  ;;  %v1795_v29 = vsub.f32 %v3208_v25, %v1787_v20 }
 0x607   :  { %2652 = vrsqrt.f32 %v1759_v13  ;;  %v1796_v32 = vsub.f32 %v3216_v36, %v1791_v24  ;;  %v1797_v33 = vsub.f32 %v3218_v42, %v1791_v24 }
 0x611   :  { %v2653_v19 = vpop.eup %2652 }
 0x612   :  { %v1805_v23 = vrot.slane %v2653_v19, %v3004_v16 }
 0x614   :  { %v1806_v26 = vcombine.high %v1805_v23, %v1805_v23  ;;  %v1813_v27 = vrot.slane %v1805_v23, %v3004_v16 }
 0x616   :  { %v1820_v30 = vrot.slane %v1806_v26, %v3004_v16  ;;  %v1824_v31 = vrot.slane %v1813_v27, %v3008_v22 }
 0x618   :  { %v1828_v34 = vrot.slane %v1820_v30, %v3008_v22  ;;  %v1831_v35 = vmul.f32 %v1824_v31, %v1794_v28  ;;  %v1832_v38 = vmul.f32 %v1824_v31, %v1795_v29 }
 0x61a   :  { %v1833_v39 = vmul.f32 %v1828_v34, %v1796_v32  ;;  %v1834_v41 = vmul.f32 %v1828_v34, %v1797_v33  ;;  %1835 = vst [vmem:[%s3260_s6] sm:$0xff] %v1831_v35  ;;  %1836 = vst [vmem:[%s3260_s6 + $0x8] sm:$0xff] %v1832_v38 }
 0x61c   :  { %1837 = vst [vmem:[%s3260_s6 + $0x10] sm:$0xff] %v1833_v39  ;;  %1838 = vst [vmem:[%s3260_s6 + $0x18] sm:$0xff] %v1834_v41 }

</bundles_post_ra>
